<compile_context>
chip_gen: v5e
topology: v5e:2x2
jax: 0.10.0
libtpu: 0.0.40
codegen_flags: <defaults>
</compile_context>

<pallas_src>
import functools

import jax
import jax.numpy as jnp
from jax.experimental import pallas as pl
from jax.experimental.pallas import tpu as pltpu


def _round_up(x, m):
    return (x + m - 1) // m * m


def _disencoding_kernel(
    # inputs ---------------------------------------------------------------
    x_ref,                            # (TB, F)          f32   batch tile
    w_in_ref, b_in_ref,               # (F, H) bf16 / (1, H) f32
    w_res_enc_ref, b_res_enc_ref,     # (L, H, H) bf16 / (L, 1, H) f32
    w_z_ref, b_z_ref,                 # (H, F*E) bf16 / (1, F*E) f32
    cbt_blk_ref,                      # (F*E, F*K)       f32   block-diag codebook^T
    cb_sq_ref,                        # (1, F*K)         f32   tiled ||codebook_k||^2
    dec_lut_ref, b_dec_ref,           # (F*K, H) bf16 / (1, H) f32  (cb @ w_dec folded)
    w_res_dec_ref, b_res_dec_ref,     # (L, H, H) bf16 / (L, 1, H) f32
    w_out_ref, b_out_ref,             # (H, F) bf16 / (1, F) f32
    # outputs --------------------------------------------------------------
    out_ref,                          # (TB, F)          f32   reconstruction
    onehot_ref,                       # (TB, F*K)        i32   lane-dense one-hot codes
    loss_ref,                         # (1, 1) SMEM      f32   per-tile partial SSE
    *, num_emb, batch_actual, batch_padded,
):
    step = pl.program_id(0)
    x = x_ref[...]                                                  # (TB, F) f32
    TB, F = x.shape
    FK = cb_sq_ref.shape[1]
    K = num_emb
    n_res = w_res_enc_ref.shape[0]

    def dense(a_f32, w_bf16, b_f32):
        # bf16 MXU matmul with f32 accumulation; elementwise stays f32.
        return jnp.dot(a_f32.astype(jnp.bfloat16), w_bf16,
                       preferred_element_type=jnp.float32) + b_f32

    # ------------------------------ encoder -------------------------------
    h = jnp.maximum(dense(x, w_in_ref[...], b_in_ref[...]), 0.0)    # (TB, H)
    for l in range(n_res):                                          # static unroll
        h = h + jnp.maximum(dense(h, w_res_enc_ref[l], b_res_enc_ref[l]), 0.0)
    z = dense(h, w_z_ref[...], b_z_ref[...])                        # (TB, F*E)

    # ------------------------ vector quantization -------------------------
    # Lane j = f*K + k holds  ||cb_k||^2 - 2 <z_f, cb_k>   (||z_f||^2 dropped:
    # constant per group, argmin unchanged).  One f32 MXU matmul, lane-dense.
    d = cb_sq_ref[...] - 2.0 * jnp.dot(z, cbt_blk_ref[...],
                                       preferred_element_type=jnp.float32)

    lane = jax.lax.broadcasted_iota(jnp.int32, d.shape, 1)
    lane_in_group = lane % K                       # position inside a K-lane group
    lane_in_group_f = lane_in_group.astype(jnp.float32)

    def grouped_min(v):
        # Min over each aligned group of K lanes, broadcast back to every lane
        # of the group.  Circular tree reduction inside the group: two lane
        # rotations (XLU) + select + min per step, ceil(log2 K) steps, no
        # sublane<->lane relayouts.  (F*K is exactly 128 lanes at these dims.)
        s = 1
        while s < K:
            a = pltpu.roll(v, shift=s, axis=1)                # lane j <- j - s
            b = pltpu.roll(v, shift=FK - (K - s), axis=1)     # lane j <- j - s + K
            v = jnp.minimum(v, jnp.where(lane_in_group >= s, a, b))
            s *= 2
        return v

    gmin = grouped_min(d)                                           # group min, all lanes
    cand = jnp.where(d == gmin, lane_in_group_f, jnp.float32(K))
    first = grouped_min(cand)                                       # first argmin per group
    onehot_f = (lane_in_group_f == first).astype(jnp.float32)       # (TB, F*K), one 1/group

    # ------------------------------ decoder -------------------------------
    # one_hot @ blockdiag(codebook @ w_dec)  ==  (quantized z) @ w_dec
    hd = jnp.maximum(
        jnp.dot(onehot_f.astype(jnp.bfloat16), dec_lut_ref[...],
                preferred_element_type=jnp.float32) + b_dec_ref[...], 0.0)
    for l in range(n_res):
        hd = hd + jnp.maximum(dense(hd, w_res_dec_ref[l], b_res_dec_ref[l]), 0.0)
    out = dense(hd, w_out_ref[...], b_out_ref[...])                 # (TB, F)

    # ------------------------------ outputs -------------------------------
    out_ref[...] = out
    onehot_ref[...] = onehot_f.astype(jnp.int32)

    # Per-tile partial sum of squared errors; normalized + reduced outside so
    # the batch grid axis can stay "parallel" (megacore on v7x).
    diff = out - x
    loss_ref[0, 0] = jnp.sum(diff * diff)
    if batch_padded != batch_actual:
        # Only the last tile can contain padded rows; full tiles skip the mask.
        @pl.when(step == pl.num_programs(0) - 1)
        def _mask_padded_rows():
            row = jax.lax.broadcasted_iota(jnp.int32, diff.shape, 0) + step * TB
            dm = jnp.where(row < batch_actual, diff, 0.0)
            loss_ref[0, 0] = jnp.sum(dm * dm)


def _resident(a):
    """Whole-array BlockSpec with a constant index_map (stays resident in VMEM)."""
    zeros = (0,) * a.ndim
    return pl.BlockSpec(a.shape, lambda i: zeros)


def mining_disencoding(x, params, *, tile_b=1024):
    """DisEncoding hot path (encoder -> VQ -> decoder -> MSE) as one Pallas kernel.

    Returns (encoding_one_hot int32 (B,F,K), recons_loss scalar, output (B,F)),
    i.e. the `output, recons_loss, encoding_one_hot = self.disencoding(x)`
    values plus the `.to(torch.int)` cast applied in Mining.forward.
    """
    B, F = x.shape
    K, E = params["codebook"].shape
    H = params["w_in"].shape[1]
    assert params["w_z"].shape == (H, F * E)

    # ---- batch tiling: one big tile unless the batch is huge ----------------
    tb = min(_round_up(B, 8), _round_up(tile_b, 8))
    Bp = _round_up(B, tb)
    n_tiles = Bp // tb
    x_p = x if Bp == B else jnp.zeros((Bp, F), x.dtype).at[:B].set(x)

    # ---- precomputed VQ / decoder constants (hoisted out of the kernel) -----
    cb = params["codebook"].astype(jnp.float32)                        # (K, E)
    cb_sq = jnp.tile(jnp.sum(cb * cb, axis=-1), (F,))[None, :]         # (1, F*K)
    cbt_blk = jnp.kron(jnp.eye(F, dtype=jnp.float32), cb.T)            # (F*E, F*K)
    dec_lut = jnp.einsum("ke,feh->fkh", cb,
                         params["w_dec"].reshape(F, E, H)).reshape(F * K, H)

    bf = lambda a: a.astype(jnp.bfloat16)
    args = (
        x_p,
        bf(params["w_in"]), params["b_in"],
        bf(params["w_res_enc"]), params["b_res_enc"],
        bf(params["w_z"]), params["b_z"],
        cbt_blk, cb_sq,
        bf(dec_lut), params["b_dec"],
        bf(params["w_res_dec"]), params["b_res_dec"],
        bf(params["w_out"]), params["b_out"],
    )

    in_specs = [pl.BlockSpec((tb, F), lambda i: (i, 0))]
    in_specs += [_resident(a) for a in args[1:]]

    out_specs = (
        pl.BlockSpec((tb, F), lambda i: (i, 0)),                       # reconstruction
        pl.BlockSpec((tb, F * K), lambda i: (i, 0)),                   # one-hot codes
        pl.BlockSpec((1, 1), lambda i: (i, 0),
                     memory_space=pltpu.MemorySpace.SMEM),             # per-tile SSE
    )
    out_shape = (
        jax.ShapeDtypeStruct((Bp, F), jnp.float32),
        jax.ShapeDtypeStruct((Bp, F * K), jnp.int32),
        jax.ShapeDtypeStruct((n_tiles, 1), jnp.float32),
    )

    # VMEM limit sized from the actual block footprint (v7x only has 64 MiB).
    block_bytes = tb * F * 4                                           # x tile
    block_bytes += sum(int(a.size) * a.dtype.itemsize for a in args[1:])
    block_bytes += tb * F * 4 + tb * F * K * 4 + 4                     # output tiles
    vmem_limit = int(min(48 * 1024 * 1024, 16 * 1024 * 1024 + 6 * block_bytes))

    kernel = functools.partial(
        _disencoding_kernel, num_emb=K, batch_actual=B, batch_padded=Bp)

    out_p, onehot_p, loss_parts = pl.pallas_call(
        kernel,
        grid=(n_tiles,),
        in_specs=in_specs,
        out_specs=out_specs,
        out_shape=out_shape,
        compiler_params=pltpu.CompilerParams(
            dimension_semantics=("parallel",),     # per-tile loss partials -> megacore OK
            vmem_limit_bytes=vmem_limit,
        ),
    )(*args)

    output = out_p[:B]
    encoding_one_hot = onehot_p[:B].reshape(B, F, K)
    recons_loss = jnp.sum(loss_parts) * (1.0 / float(B * F))
    return encoding_one_hot, recons_loss, output


def disencoding_reference(x, params):
    """Pure-JAX reference mirroring the kernel's bf16-matmul / f32-accum recipe."""
    B, F = x.shape
    K, E = params["codebook"].shape

    def dense(a, w, b):
        return jnp.dot(a.astype(jnp.bfloat16), w.astype(jnp.bfloat16),
                       preferred_element_type=jnp.float32) + b

    relu = lambda v: jnp.maximum(v, 0.0)
    h = relu(dense(x, params["w_in"], params["b_in"]))
    for l in range(params["w_res_enc"].shape[0]):
        h = h + relu(dense(h, params["w_res_enc"][l], params["b_res_enc"][l]))
    z = dense(h, params["w_z"], params["b_z"]).reshape(B * F, E)
    cb = params["codebook"]
    d = jnp.sum(cb * cb, axis=-1)[None, :] - 2.0 * jnp.dot(z, cb.T)
    idx = jnp.argmin(d, axis=-1)
    onehot = jax.nn.one_hot(idx, K, dtype=jnp.float32)                 # (B*F, K)
    zq = jnp.dot(onehot, cb).reshape(B, F * E)
    hd = relu(dense(zq, params["w_dec"], params["b_dec"]))
    for l in range(params["w_res_dec"].shape[0]):
        hd = hd + relu(dense(hd, params["w_res_dec"][l], params["b_res_dec"][l]))
    out = dense(hd, params["w_out"], params["b_out"])
    loss = jnp.mean((out - x) ** 2)
    return onehot.reshape(B, F, K).astype(jnp.int32), loss, out


def init_params(key, fea_num, fea_emb, num_emb, h_dim, n_res_layers):
    ks = jax.random.split(key, 10)
    s = 0.1
    return {
        "w_in":      s * jax.random.normal(ks[0], (fea_num, h_dim), jnp.float32),
        "b_in":      jnp.zeros((1, h_dim), jnp.float32),
        "w_res_enc": s * jax.random.normal(ks[1], (n_res_layers, h_dim, h_dim), jnp.float32),
        "b_res_enc": jnp.zeros((n_res_layers, 1, h_dim), jnp.float32),
        "w_z":       s * jax.random.normal(ks[2], (h_dim, fea_num * fea_emb), jnp.float32),
        "b_z":       jnp.zeros((1, fea_num * fea_emb), jnp.float32),
        "codebook":  s * jax.random.normal(ks[3], (num_emb, fea_emb), jnp.float32),
        "w_dec":     s * jax.random.normal(ks[4], (fea_num * fea_emb, h_dim), jnp.float32),
        "b_dec":     jnp.zeros((1, h_dim), jnp.float32),
        "w_res_dec": s * jax.random.normal(ks[5], (n_res_layers, h_dim, h_dim), jnp.float32),
        "b_res_dec": jnp.zeros((n_res_layers, 1, h_dim), jnp.float32),
        "w_out":     s * jax.random.normal(ks[6], (h_dim, fea_num), jnp.float32),
        "b_out":     jnp.zeros((1, fea_num), jnp.float32),
    }


if __name__ == "__main__":
    # Shapes consistent with the module constructor; F*K = 128 (lane-exact).
    # batch is a non-multiple of the tile to exercise padding + loss masking.
    batch, fea_num, fea_emb, num_emb, h_dim, n_res_layers = 50, 8, 8, 16, 32, 2

    key = jax.random.PRNGKey(0)
    kx, kp = jax.random.split(key)
    x = jax.random.normal(kx, (batch, fea_num), jnp.float32)
    params = init_params(kp, fea_num, fea_emb, num_emb, h_dim, n_res_layers)

    # default: single batch tile / single grid step
    oh1, loss1, out1 = mining_disencoding(x, params)
    # small tile: multi-step "parallel" grid with per-tile loss partials
    oh2, loss2, out2 = mining_disencoding(x, params, tile_b=16)
    jax.block_until_ready((oh1, loss1, out1, oh2, loss2, out2))

    # structural checks
    assert oh1.shape == (batch, fea_num, num_emb) and oh1.dtype == jnp.int32
    assert out1.shape == (batch, fea_num) and out1.dtype == jnp.float32
    assert loss1.shape == ()
    row_sums = jnp.sum(oh1, axis=-1)
    assert int(jnp.min(row_sums)) == 1 and int(jnp.max(row_sums)) == 1
    assert bool(jnp.isfinite(loss1))

    # single-tile vs tiled grid must agree (per-row math is tile-independent)
    assert float(jnp.mean(jnp.all(oh1 == oh2, axis=(1, 2)))) >= 0.98
    assert bool(jnp.allclose(loss1, loss2, rtol=1e-3, atol=1e-5))

    # pure-JAX reference using the same bf16-matmul / f32-accumulate recipe
    oh_r, loss_r, out_r = disencoding_reference(x, params)
    row_match = jnp.all(oh1 == oh_r, axis=(1, 2))
    assert float(jnp.mean(row_match)) >= 0.9
    assert bool(jnp.allclose(out1[row_match], out_r[row_match], atol=5e-2, rtol=5e-2))
    assert bool(jnp.allclose(loss1, loss_r, rtol=2e-1, atol=5e-2))

    print("KERNEL_OK")
</pallas_src>

<mosaic_0001>
module attributes {stable_mosaic.version = 11 : i64} {
  func.func @_disencoding_kernel(%arg0: i32, %arg1: memref<56x8xf32, #tpu.memory_space<vmem>>, %arg2: memref<8x32xbf16, #tpu.memory_space<vmem>>, %arg3: memref<1x32xf32, #tpu.memory_space<vmem>>, %arg4: memref<2x32x32xbf16, #tpu.memory_space<vmem>>, %arg5: memref<2x1x32xf32, #tpu.memory_space<vmem>>, %arg6: memref<32x64xbf16, #tpu.memory_space<vmem>>, %arg7: memref<1x64xf32, #tpu.memory_space<vmem>>, %arg8: memref<64x128xf32, #tpu.memory_space<vmem>>, %arg9: memref<1x128xf32, #tpu.memory_space<vmem>>, %arg10: memref<128x32xbf16, #tpu.memory_space<vmem>>, %arg11: memref<1x32xf32, #tpu.memory_space<vmem>>, %arg12: memref<2x32x32xbf16, #tpu.memory_space<vmem>>, %arg13: memref<2x1x32xf32, #tpu.memory_space<vmem>>, %arg14: memref<32x8xbf16, #tpu.memory_space<vmem>>, %arg15: memref<1x8xf32, #tpu.memory_space<vmem>>, %arg16: memref<56x8xf32, #tpu.memory_space<vmem>>, %arg17: memref<56x128xi32, #tpu.memory_space<vmem>>, %arg18: memref<1x1xf32, #tpu.memory_space<smem>>) attributes {dimension_semantics = [#tpu.dimension_semantics<parallel>], iteration_bounds = array<i64: 1>, scalar_prefetch = 0 : i64, scratch_operands = 0 : i64, tpu.core_type = #tpu.core_type<tc>, window_params = [{transform_indices = @transform_0, window_bounds = array<i64: 56, 8>}, {pipeline_mode = #tpu.pipeline_mode<synchronous>, transform_indices = @transform_1, window_bounds = array<i64: 8, 32>}, {pipeline_mode = #tpu.pipeline_mode<synchronous>, transform_indices = @transform_2, window_bounds = array<i64: 1, 32>}, {pipeline_mode = #tpu.pipeline_mode<synchronous>, transform_indices = @transform_3, window_bounds = array<i64: 2, 32, 32>}, {pipeline_mode = #tpu.pipeline_mode<synchronous>, transform_indices = @transform_4, window_bounds = array<i64: 2, 1, 32>}, {pipeline_mode = #tpu.pipeline_mode<synchronous>, transform_indices = @transform_5, window_bounds = array<i64: 32, 64>}, {pipeline_mode = #tpu.pipeline_mode<synchronous>, transform_indices = @transform_6, window_bounds = array<i64: 1, 64>}, {pipeline_mode = #tpu.pipeline_mode<synchronous>, transform_indices = @transform_7, window_bounds = array<i64: 64, 128>}, {pipeline_mode = #tpu.pipeline_mode<synchronous>, transform_indices = @transform_8, window_bounds = array<i64: 1, 128>}, {pipeline_mode = #tpu.pipeline_mode<synchronous>, transform_indices = @transform_9, window_bounds = array<i64: 128, 32>}, {pipeline_mode = #tpu.pipeline_mode<synchronous>, transform_indices = @transform_10, window_bounds = array<i64: 1, 32>}, {pipeline_mode = #tpu.pipeline_mode<synchronous>, transform_indices = @transform_11, window_bounds = array<i64: 2, 32, 32>}, {pipeline_mode = #tpu.pipeline_mode<synchronous>, transform_indices = @transform_12, window_bounds = array<i64: 2, 1, 32>}, {pipeline_mode = #tpu.pipeline_mode<synchronous>, transform_indices = @transform_13, window_bounds = array<i64: 32, 8>}, {pipeline_mode = #tpu.pipeline_mode<synchronous>, transform_indices = @transform_14, window_bounds = array<i64: 1, 8>}, {transform_indices = @transform_15, window_bounds = array<i64: 56, 8>}, {transform_indices = @transform_16, window_bounds = array<i64: 56, 128>}, {transform_indices = @transform_17, window_bounds = array<i64: 1, 1>}]} {
    %c0 = arith.constant 0 : index
    %c0_0 = arith.constant 0 : index
    %0 = vector.load %arg1[%c0, %c0_0] : memref<56x8xf32, #tpu.memory_space<vmem>>, vector<56x8xf32>
    %c0_1 = arith.constant 0 : index
    %c0_2 = arith.constant 0 : index
    %1 = vector.load %arg2[%c0_1, %c0_2] : memref<8x32xbf16, #tpu.memory_space<vmem>>, vector<8x32xbf16>
    %c0_3 = arith.constant 0 : index
    %c0_4 = arith.constant 0 : index
    %2 = vector.load %arg3[%c0_3, %c0_4] : memref<1x32xf32, #tpu.memory_space<vmem>>, vector<1x32xf32>
    %3 = arith.truncf %0 : vector<56x8xf32> to vector<56x8xbf16>
    %cst = arith.constant dense<0.000000e+00> : vector<56x32xf32>
    %4 = tpu.matmul %3, %1, %cst {dimension_numbers = #tpu.dot_dimension_numbers<[1], [0], [0], [1], [0, 0, 1, 1], [], []>} : vector<56x8xbf16>, vector<8x32xbf16>, vector<56x32xf32> -> vector<56x32xf32>
    %5 = vector.broadcast %2 : vector<1x32xf32> to vector<56x32xf32>
    %6 = arith.addf %4, %5 : vector<56x32xf32>
    %cst_5 = arith.constant 0.000000e+00 : f32
    %7 = vector.broadcast %cst_5 : f32 to vector<56x32xf32>
    %8 = arith.maximumf %6, %7 : vector<56x32xf32>
    %c0_6 = arith.constant 0 : index
    %c0_7 = arith.constant 0 : index
    %c0_8 = arith.constant 0 : index
    %9 = vector.load %arg4[%c0_6, %c0_7, %c0_8] : memref<2x32x32xbf16, #tpu.memory_space<vmem>>, vector<1x32x32xbf16>
    %10 = vector.shape_cast %9 : vector<1x32x32xbf16> to vector<32x32xbf16>
    %c0_9 = arith.constant 0 : index
    %c0_10 = arith.constant 0 : index
    %c0_11 = arith.constant 0 : index
    %11 = vector.load %arg5[%c0_9, %c0_10, %c0_11] : memref<2x1x32xf32, #tpu.memory_space<vmem>>, vector<1x1x32xf32>
    %12 = vector.shape_cast %11 : vector<1x1x32xf32> to vector<1x32xf32>
    %13 = arith.truncf %8 : vector<56x32xf32> to vector<56x32xbf16>
    %cst_12 = arith.constant dense<0.000000e+00> : vector<56x32xf32>
    %14 = tpu.matmul %13, %10, %cst_12 {dimension_numbers = #tpu.dot_dimension_numbers<[1], [0], [0], [1], [0, 0, 1, 1], [], []>} : vector<56x32xbf16>, vector<32x32xbf16>, vector<56x32xf32> -> vector<56x32xf32>
    %15 = vector.broadcast %12 : vector<1x32xf32> to vector<56x32xf32>
    %16 = arith.addf %14, %15 : vector<56x32xf32>
    %cst_13 = arith.constant 0.000000e+00 : f32
    %17 = vector.broadcast %cst_13 : f32 to vector<56x32xf32>
    %18 = arith.maximumf %16, %17 : vector<56x32xf32>
    %19 = arith.addf %8, %18 : vector<56x32xf32>
    %c1 = arith.constant 1 : index
    %c0_14 = arith.constant 0 : index
    %c0_15 = arith.constant 0 : index
    %20 = vector.load %arg4[%c1, %c0_14, %c0_15] : memref<2x32x32xbf16, #tpu.memory_space<vmem>>, vector<1x32x32xbf16>
    %21 = vector.shape_cast %20 : vector<1x32x32xbf16> to vector<32x32xbf16>
    %c1_16 = arith.constant 1 : index
    %c0_17 = arith.constant 0 : index
    %c0_18 = arith.constant 0 : index
    %22 = vector.load %arg5[%c1_16, %c0_17, %c0_18] : memref<2x1x32xf32, #tpu.memory_space<vmem>>, vector<1x1x32xf32>
    %23 = vector.shape_cast %22 : vector<1x1x32xf32> to vector<1x32xf32>
    %24 = arith.truncf %19 : vector<56x32xf32> to vector<56x32xbf16>
    %cst_19 = arith.constant dense<0.000000e+00> : vector<56x32xf32>
    %25 = tpu.matmul %24, %21, %cst_19 {dimension_numbers = #tpu.dot_dimension_numbers<[1], [0], [0], [1], [0, 0, 1, 1], [], []>} : vector<56x32xbf16>, vector<32x32xbf16>, vector<56x32xf32> -> vector<56x32xf32>
    %26 = vector.broadcast %23 : vector<1x32xf32> to vector<56x32xf32>
    %27 = arith.addf %25, %26 : vector<56x32xf32>
    %cst_20 = arith.constant 0.000000e+00 : f32
    %28 = vector.broadcast %cst_20 : f32 to vector<56x32xf32>
    %29 = arith.maximumf %27, %28 : vector<56x32xf32>
    %30 = arith.addf %19, %29 : vector<56x32xf32>
    %c0_21 = arith.constant 0 : index
    %c0_22 = arith.constant 0 : index
    %31 = vector.load %arg6[%c0_21, %c0_22] : memref<32x64xbf16, #tpu.memory_space<vmem>>, vector<32x64xbf16>
    %c0_23 = arith.constant 0 : index
    %c0_24 = arith.constant 0 : index
    %32 = vector.load %arg7[%c0_23, %c0_24] : memref<1x64xf32, #tpu.memory_space<vmem>>, vector<1x64xf32>
    %33 = arith.truncf %30 : vector<56x32xf32> to vector<56x32xbf16>
    %cst_25 = arith.constant dense<0.000000e+00> : vector<56x64xf32>
    %34 = tpu.matmul %33, %31, %cst_25 {dimension_numbers = #tpu.dot_dimension_numbers<[1], [0], [0], [1], [0, 0, 1, 1], [], []>} : vector<56x32xbf16>, vector<32x64xbf16>, vector<56x64xf32> -> vector<56x64xf32>
    %35 = vector.broadcast %32 : vector<1x64xf32> to vector<56x64xf32>
    %36 = arith.addf %34, %35 : vector<56x64xf32>
    %c0_26 = arith.constant 0 : index
    %c0_27 = arith.constant 0 : index
    %37 = vector.load %arg9[%c0_26, %c0_27] : memref<1x128xf32, #tpu.memory_space<vmem>>, vector<1x128xf32>
    %c0_28 = arith.constant 0 : index
    %c0_29 = arith.constant 0 : index
    %38 = vector.load %arg8[%c0_28, %c0_29] : memref<64x128xf32, #tpu.memory_space<vmem>>, vector<64x128xf32>
    %cst_30 = arith.constant dense<0.000000e+00> : vector<56x128xf32>
    %39 = tpu.matmul %36, %38, %cst_30 {dimension_numbers = #tpu.dot_dimension_numbers<[1], [0], [0], [1], [0, 0, 1, 1], [], []>} : vector<56x64xf32>, vector<64x128xf32>, vector<56x128xf32> -> vector<56x128xf32>
    %cst_31 = arith.constant 2.000000e+00 : f32
    %40 = vector.broadcast %cst_31 : f32 to vector<56x128xf32>
    %41 = arith.mulf %40, %39 : vector<56x128xf32>
    %42 = vector.broadcast %37 : vector<1x128xf32> to vector<56x128xf32>
    %43 = arith.subf %42, %41 : vector<56x128xf32>
    %44 = tpu.iota {dimensions = array<i32: 1>} : vector<56x128xi32>
    %c16_i32 = arith.constant 16 : i32
    %c0_i32 = arith.constant 0 : i32
    %45 = arith.cmpi eq, %c16_i32, %c0_i32 : i32
    %c1_i32 = arith.constant 1 : i32
    %46 = arith.select %45, %c1_i32, %c16_i32 : i32
    %47 = vector.broadcast %46 : i32 to vector<56x128xi32>
    %48 = arith.remsi %44, %47 : vector<56x128xi32>
    %c0_i32_32 = arith.constant 0 : i32
    %49 = vector.broadcast %c0_i32_32 : i32 to vector<56x128xi32>
    %50 = arith.cmpi ne, %48, %49 : vector<56x128xi32>
    %c0_i32_33 = arith.constant 0 : i32
    %51 = vector.broadcast %c0_i32_33 : i32 to vector<56x128xi32>
    %52 = arith.cmpi slt, %48, %51 : vector<56x128xi32>
    %c0_i32_34 = arith.constant 0 : i32
    %53 = arith.cmpi slt, %46, %c0_i32_34 : i32
    %54 = vector.broadcast %53 : i1 to vector<56x128xi1>
    %55 = vector.broadcast %54 : vector<56x128xi1> to vector<56x128xi1>
    %56 = arith.xori %52, %55 : vector<56x128xi1>
    %57 = arith.andi %56, %50 : vector<56x128xi1>
    %58 = vector.broadcast %46 : i32 to vector<56x128xi32>
    %59 = arith.addi %48, %58 : vector<56x128xi32>
    %60 = arith.select %57, %59, %48 : vector<56x128xi1>, vector<56x128xi32>
    %61 = arith.sitofp %60 : vector<56x128xi32> to vector<56x128xf32>
    %c1_i32_35 = arith.constant 1 : i32
    %62 = tpu.dynamic_rotate %43 by %c1_i32_35 dim 1 : vector<56x128xf32>, i32 -> vector<56x128xf32>
    %c113_i32 = arith.constant 113 : i32
    %63 = tpu.dynamic_rotate %43 by %c113_i32 dim 1 : vector<56x128xf32>, i32 -> vector<56x128xf32>
    %c1_i32_36 = arith.constant 1 : i32
    %64 = vector.broadcast %c1_i32_36 : i32 to vector<56x128xi32>
    %65 = arith.cmpi sge, %60, %64 : vector<56x128xi32>
    %66 = arith.select %65, %62, %63 : vector<56x128xi1>, vector<56x128xf32>
    %67 = arith.minimumf %43, %66 : vector<56x128xf32>
    %c2_i32 = arith.constant 2 : i32
    %68 = tpu.dynamic_rotate %67 by %c2_i32 dim 1 : vector<56x128xf32>, i32 -> vector<56x128xf32>
    %c114_i32 = arith.constant 114 : i32
    %69 = tpu.dynamic_rotate %67 by %c114_i32 dim 1 : vector<56x128xf32>, i32 -> vector<56x128xf32>
    %c2_i32_37 = arith.constant 2 : i32
    %70 = vector.broadcast %c2_i32_37 : i32 to vector<56x128xi32>
    %71 = arith.cmpi sge, %60, %70 : vector<56x128xi32>
    %72 = arith.select %71, %68, %69 : vector<56x128xi1>, vector<56x128xf32>
    %73 = arith.minimumf %67, %72 : vector<56x128xf32>
    %c4_i32 = arith.constant 4 : i32
    %74 = tpu.dynamic_rotate %73 by %c4_i32 dim 1 : vector<56x128xf32>, i32 -> vector<56x128xf32>
    %c116_i32 = arith.constant 116 : i32
    %75 = tpu.dynamic_rotate %73 by %c116_i32 dim 1 : vector<56x128xf32>, i32 -> vector<56x128xf32>
    %c4_i32_38 = arith.constant 4 : i32
    %76 = vector.broadcast %c4_i32_38 : i32 to vector<56x128xi32>
    %77 = arith.cmpi sge, %60, %76 : vector<56x128xi32>
    %78 = arith.select %77, %74, %75 : vector<56x128xi1>, vector<56x128xf32>
    %79 = arith.minimumf %73, %78 : vector<56x128xf32>
    %c8_i32 = arith.constant 8 : i32
    %80 = tpu.dynamic_rotate %79 by %c8_i32 dim 1 : vector<56x128xf32>, i32 -> vector<56x128xf32>
    %c120_i32 = arith.constant 120 : i32
    %81 = tpu.dynamic_rotate %79 by %c120_i32 dim 1 : vector<56x128xf32>, i32 -> vector<56x128xf32>
    %c8_i32_39 = arith.constant 8 : i32
    %82 = vector.broadcast %c8_i32_39 : i32 to vector<56x128xi32>
    %83 = arith.cmpi sge, %60, %82 : vector<56x128xi32>
    %84 = arith.select %83, %80, %81 : vector<56x128xi1>, vector<56x128xf32>
    %85 = arith.minimumf %79, %84 : vector<56x128xf32>
    %86 = arith.cmpf oeq, %43, %85 : vector<56x128xf32>
    %cst_40 = arith.constant 1.600000e+01 : f32
    %87 = vector.broadcast %cst_40 : f32 to vector<56x128xf32>
    %88 = arith.select %86, %61, %87 : vector<56x128xi1>, vector<56x128xf32>
    %c1_i32_41 = arith.constant 1 : i32
    %89 = tpu.dynamic_rotate %88 by %c1_i32_41 dim 1 : vector<56x128xf32>, i32 -> vector<56x128xf32>
    %c113_i32_42 = arith.constant 113 : i32
    %90 = tpu.dynamic_rotate %88 by %c113_i32_42 dim 1 : vector<56x128xf32>, i32 -> vector<56x128xf32>
    %c1_i32_43 = arith.constant 1 : i32
    %91 = vector.broadcast %c1_i32_43 : i32 to vector<56x128xi32>
    %92 = arith.cmpi sge, %60, %91 : vector<56x128xi32>
    %93 = arith.select %92, %89, %90 : vector<56x128xi1>, vector<56x128xf32>
    %94 = arith.minimumf %88, %93 : vector<56x128xf32>
    %c2_i32_44 = arith.constant 2 : i32
    %95 = tpu.dynamic_rotate %94 by %c2_i32_44 dim 1 : vector<56x128xf32>, i32 -> vector<56x128xf32>
    %c114_i32_45 = arith.constant 114 : i32
    %96 = tpu.dynamic_rotate %94 by %c114_i32_45 dim 1 : vector<56x128xf32>, i32 -> vector<56x128xf32>
    %c2_i32_46 = arith.constant 2 : i32
    %97 = vector.broadcast %c2_i32_46 : i32 to vector<56x128xi32>
    %98 = arith.cmpi sge, %60, %97 : vector<56x128xi32>
    %99 = arith.select %98, %95, %96 : vector<56x128xi1>, vector<56x128xf32>
    %100 = arith.minimumf %94, %99 : vector<56x128xf32>
    %c4_i32_47 = arith.constant 4 : i32
    %101 = tpu.dynamic_rotate %100 by %c4_i32_47 dim 1 : vector<56x128xf32>, i32 -> vector<56x128xf32>
    %c116_i32_48 = arith.constant 116 : i32
    %102 = tpu.dynamic_rotate %100 by %c116_i32_48 dim 1 : vector<56x128xf32>, i32 -> vector<56x128xf32>
    %c4_i32_49 = arith.constant 4 : i32
    %103 = vector.broadcast %c4_i32_49 : i32 to vector<56x128xi32>
    %104 = arith.cmpi sge, %60, %103 : vector<56x128xi32>
    %105 = arith.select %104, %101, %102 : vector<56x128xi1>, vector<56x128xf32>
    %106 = arith.minimumf %100, %105 : vector<56x128xf32>
    %c8_i32_50 = arith.constant 8 : i32
    %107 = tpu.dynamic_rotate %106 by %c8_i32_50 dim 1 : vector<56x128xf32>, i32 -> vector<56x128xf32>
    %c120_i32_51 = arith.constant 120 : i32
    %108 = tpu.dynamic_rotate %106 by %c120_i32_51 dim 1 : vector<56x128xf32>, i32 -> vector<56x128xf32>
    %c8_i32_52 = arith.constant 8 : i32
    %109 = vector.broadcast %c8_i32_52 : i32 to vector<56x128xi32>
    %110 = arith.cmpi sge, %60, %109 : vector<56x128xi32>
    %111 = arith.select %110, %107, %108 : vector<56x128xi1>, vector<56x128xf32>
    %112 = arith.minimumf %106, %111 : vector<56x128xf32>
    %113 = arith.cmpf oeq, %61, %112 : vector<56x128xf32>
    %114 = arith.extui %113 : vector<56x128xi1> to vector<56x128xi32>
    %115 = arith.sitofp %114 : vector<56x128xi32> to vector<56x128xf32>
    %116 = arith.truncf %115 : vector<56x128xf32> to vector<56x128xbf16>
    %c0_53 = arith.constant 0 : index
    %c0_54 = arith.constant 0 : index
    %117 = vector.load %arg10[%c0_53, %c0_54] : memref<128x32xbf16, #tpu.memory_space<vmem>>, vector<128x32xbf16>
    %cst_55 = arith.constant dense<0.000000e+00> : vector<56x32xf32>
    %118 = tpu.matmul %116, %117, %cst_55 {dimension_numbers = #tpu.dot_dimension_numbers<[1], [0], [0], [1], [0, 0, 1, 1], [], []>} : vector<56x128xbf16>, vector<128x32xbf16>, vector<56x32xf32> -> vector<56x32xf32>
    %c0_56 = arith.constant 0 : index
    %c0_57 = arith.constant 0 : index
    %119 = vector.load %arg11[%c0_56, %c0_57] : memref<1x32xf32, #tpu.memory_space<vmem>>, vector<1x32xf32>
    %120 = vector.broadcast %119 : vector<1x32xf32> to vector<56x32xf32>
    %121 = arith.addf %118, %120 : vector<56x32xf32>
    %cst_58 = arith.constant 0.000000e+00 : f32
    %122 = vector.broadcast %cst_58 : f32 to vector<56x32xf32>
    %123 = arith.maximumf %121, %122 : vector<56x32xf32>
    %c0_59 = arith.constant 0 : index
    %c0_60 = arith.constant 0 : index
    %c0_61 = arith.constant 0 : index
    %124 = vector.load %arg12[%c0_59, %c0_60, %c0_61] : memref<2x32x32xbf16, #tpu.memory_space<vmem>>, vector<1x32x32xbf16>
    %125 = vector.shape_cast %124 : vector<1x32x32xbf16> to vector<32x32xbf16>
    %c0_62 = arith.constant 0 : index
    %c0_63 = arith.constant 0 : index
    %c0_64 = arith.constant 0 : index
    %126 = vector.load %arg13[%c0_62, %c0_63, %c0_64] : memref<2x1x32xf32, #tpu.memory_space<vmem>>, vector<1x1x32xf32>
    %127 = vector.shape_cast %126 : vector<1x1x32xf32> to vector<1x32xf32>
    %128 = arith.truncf %123 : vector<56x32xf32> to vector<56x32xbf16>
    %cst_65 = arith.constant dense<0.000000e+00> : vector<56x32xf32>
    %129 = tpu.matmul %128, %125, %cst_65 {dimension_numbers = #tpu.dot_dimension_numbers<[1], [0], [0], [1], [0, 0, 1, 1], [], []>} : vector<56x32xbf16>, vector<32x32xbf16>, vector<56x32xf32> -> vector<56x32xf32>
    %130 = vector.broadcast %127 : vector<1x32xf32> to vector<56x32xf32>
    %131 = arith.addf %129, %130 : vector<56x32xf32>
    %cst_66 = arith.constant 0.000000e+00 : f32
    %132 = vector.broadcast %cst_66 : f32 to vector<56x32xf32>
    %133 = arith.maximumf %131, %132 : vector<56x32xf32>
    %134 = arith.addf %123, %133 : vector<56x32xf32>
    %c1_67 = arith.constant 1 : index
    %c0_68 = arith.constant 0 : index
    %c0_69 = arith.constant 0 : index
    %135 = vector.load %arg12[%c1_67, %c0_68, %c0_69] : memref<2x32x32xbf16, #tpu.memory_space<vmem>>, vector<1x32x32xbf16>
    %136 = vector.shape_cast %135 : vector<1x32x32xbf16> to vector<32x32xbf16>
    %c1_70 = arith.constant 1 : index
    %c0_71 = arith.constant 0 : index
    %c0_72 = arith.constant 0 : index
    %137 = vector.load %arg13[%c1_70, %c0_71, %c0_72] : memref<2x1x32xf32, #tpu.memory_space<vmem>>, vector<1x1x32xf32>
    %138 = vector.shape_cast %137 : vector<1x1x32xf32> to vector<1x32xf32>
    %139 = arith.truncf %134 : vector<56x32xf32> to vector<56x32xbf16>
    %cst_73 = arith.constant dense<0.000000e+00> : vector<56x32xf32>
    %140 = tpu.matmul %139, %136, %cst_73 {dimension_numbers = #tpu.dot_dimension_numbers<[1], [0], [0], [1], [0, 0, 1, 1], [], []>} : vector<56x32xbf16>, vector<32x32xbf16>, vector<56x32xf32> -> vector<56x32xf32>
    %141 = vector.broadcast %138 : vector<1x32xf32> to vector<56x32xf32>
    %142 = arith.addf %140, %141 : vector<56x32xf32>
    %cst_74 = arith.constant 0.000000e+00 : f32
    %143 = vector.broadcast %cst_74 : f32 to vector<56x32xf32>
    %144 = arith.maximumf %142, %143 : vector<56x32xf32>
    %145 = arith.addf %134, %144 : vector<56x32xf32>
    %c0_75 = arith.constant 0 : index
    %c0_76 = arith.constant 0 : index
    %146 = vector.load %arg14[%c0_75, %c0_76] : memref<32x8xbf16, #tpu.memory_space<vmem>>, vector<32x8xbf16>
    %c0_77 = arith.constant 0 : index
    %c0_78 = arith.constant 0 : index
    %147 = vector.load %arg15[%c0_77, %c0_78] : memref<1x8xf32, #tpu.memory_space<vmem>>, vector<1x8xf32>
    %148 = arith.truncf %145 : vector<56x32xf32> to vector<56x32xbf16>
    %cst_79 = arith.constant dense<0.000000e+00> : vector<56x8xf32>
    %149 = tpu.matmul %148, %146, %cst_79 {dimension_numbers = #tpu.dot_dimension_numbers<[1], [0], [0], [1], [0, 0, 1, 1], [], []>} : vector<56x32xbf16>, vector<32x8xbf16>, vector<56x8xf32> -> vector<56x8xf32>
    %150 = vector.broadcast %147 : vector<1x8xf32> to vector<56x8xf32>
    %151 = arith.addf %149, %150 : vector<56x8xf32>
    %c0_80 = arith.constant 0 : index
    %c0_81 = arith.constant 0 : index
    %152 = vector.load %arg16[%c0_80, %c0_81] : memref<56x8xf32, #tpu.memory_space<vmem>>, vector<56x8xf32>
    tpu.vector_store %arg16[%c0_80, %c0_81], %151 {strides = array<i32>} : memref<56x8xf32, #tpu.memory_space<vmem>>, vector<56x8xf32>,
    %153 = arith.fptosi %115 : vector<56x128xf32> to vector<56x128xi32>
    %c0_82 = arith.constant 0 : index
    %c0_83 = arith.constant 0 : index
    %154 = vector.load %arg17[%c0_82, %c0_83] : memref<56x128xi32, #tpu.memory_space<vmem>>, vector<56x128xi32>
    tpu.vector_store %arg17[%c0_82, %c0_83], %153 {strides = array<i32>} : memref<56x128xi32, #tpu.memory_space<vmem>>, vector<56x128xi32>,
    %155 = arith.subf %151, %0 : vector<56x8xf32>
    %156 = arith.mulf %155, %155 : vector<56x8xf32>
    %157 = vector.shape_cast %156 : vector<56x8xf32> to vector<1x56x8xf32>
    %cst_84 = arith.constant dense<0.000000e+00> : vector<1xf32>
    %158 = vector.multi_reduction <add>, %157, %cst_84 [1, 2] : vector<1x56x8xf32> to vector<1xf32>
    %159 = vector.shape_cast %158 : vector<1xf32> to vector<1x1x1xf32>
    %160 = vector.extract %159[0, 0, 0] : f32 from vector<1x1x1xf32>
    %c0_85 = arith.constant 0 : index
    %c0_86 = arith.constant 0 : index
    %161 = memref.load %arg18[%c0_85, %c0_86] : memref<1x1xf32, #tpu.memory_space<smem>>
    memref.store %160, %arg18[%c0_85, %c0_86] : memref<1x1xf32, #tpu.memory_space<smem>>
    %c0_i32_87 = arith.constant 0 : i32
    %162 = arith.cmpi eq, %arg0, %c0_i32_87 : i32
    %163 = arith.extui %162 : i1 to i32
    %c0_i32_88 = arith.constant 0 : i32
    %164 = arith.cmpi ne, %163, %c0_i32_88 : i32
    scf.if %164 {
      %165 = tpu.iota {dimensions = array<i32: 0>} : vector<56x8xi32>
      %c56_i32 = arith.constant 56 : i32
      %166 = arith.muli %arg0, %c56_i32 : i32
      %167 = vector.broadcast %166 : i32 to vector<56x8xi32>
      %168 = arith.addi %165, %167 : vector<56x8xi32>
      %c50_i32 = arith.constant 50 : i32
      %169 = vector.broadcast %c50_i32 : i32 to vector<56x8xi32>
      %170 = arith.cmpi slt, %168, %169 : vector<56x8xi32>
      %cst_89 = arith.constant 0.000000e+00 : f32
      %171 = vector.broadcast %cst_89 : f32 to vector<56x8xf32>
      %172 = arith.select %170, %155, %171 : vector<56x8xi1>, vector<56x8xf32>
      %173 = arith.mulf %172, %172 : vector<56x8xf32>
      %174 = vector.shape_cast %173 : vector<56x8xf32> to vector<1x56x8xf32>
      %cst_90 = arith.constant dense<0.000000e+00> : vector<1xf32>
      %175 = vector.multi_reduction <add>, %174, %cst_90 [1, 2] : vector<1x56x8xf32> to vector<1xf32>
      %176 = vector.shape_cast %175 : vector<1xf32> to vector<1x1x1xf32>
      %177 = vector.extract %176[0, 0, 0] : f32 from vector<1x1x1xf32>
      %c0_91 = arith.constant 0 : index
      %c0_92 = arith.constant 0 : index
      %178 = memref.load %arg18[%c0_91, %c0_92] : memref<1x1xf32, #tpu.memory_space<smem>>
      memref.store %177, %arg18[%c0_91, %c0_92] : memref<1x1xf32, #tpu.memory_space<smem>>
    } else {
    }
    return
  }
  func.func @transform_0(%arg0: i32) -> (i32, i32) {
    %c0_i32 = arith.constant 0 : i32
    %c0_i32_0 = arith.constant 0 : i32
    return %arg0, %c0_i32 : i32, i32
  }
  func.func @transform_1(%arg0: i32) -> (i32, i32) {
    %c0_i32 = arith.constant 0 : i32
    %c0_i32_0 = arith.constant 0 : i32
    %c0_i32_1 = arith.constant 0 : i32
    return %c0_i32, %c0_i32_0 : i32, i32
  }
  func.func @transform_2(%arg0: i32) -> (i32, i32) {
    %c0_i32 = arith.constant 0 : i32
    %c0_i32_0 = arith.constant 0 : i32
    %c0_i32_1 = arith.constant 0 : i32
    return %c0_i32, %c0_i32_0 : i32, i32
  }
  func.func @transform_3(%arg0: i32) -> (i32, i32, i32) {
    %c0_i32 = arith.constant 0 : i32
    %c0_i32_0 = arith.constant 0 : i32
    %c0_i32_1 = arith.constant 0 : i32
    %c0_i32_2 = arith.constant 0 : i32
    return %c0_i32, %c0_i32_0, %c0_i32_1 : i32, i32, i32
  }
  func.func @transform_4(%arg0: i32) -> (i32, i32, i32) {
    %c0_i32 = arith.constant 0 : i32
    %c0_i32_0 = arith.constant 0 : i32
    %c0_i32_1 = arith.constant 0 : i32
    %c0_i32_2 = arith.constant 0 : i32
    return %c0_i32, %c0_i32_0, %c0_i32_1 : i32, i32, i32
  }
  func.func @transform_5(%arg0: i32) -> (i32, i32) {
    %c0_i32 = arith.constant 0 : i32
    %c0_i32_0 = arith.constant 0 : i32
    %c0_i32_1 = arith.constant 0 : i32
    return %c0_i32, %c0_i32_0 : i32, i32
  }
  func.func @transform_6(%arg0: i32) -> (i32, i32) {
    %c0_i32 = arith.constant 0 : i32
    %c0_i32_0 = arith.constant 0 : i32
    %c0_i32_1 = arith.constant 0 : i32
    return %c0_i32, %c0_i32_0 : i32, i32
  }
  func.func @transform_7(%arg0: i32) -> (i32, i32) {
    %c0_i32 = arith.constant 0 : i32
    %c0_i32_0 = arith.constant 0 : i32
    %c0_i32_1 = arith.constant 0 : i32
    return %c0_i32, %c0_i32_0 : i32, i32
  }
  func.func @transform_8(%arg0: i32) -> (i32, i32) {
    %c0_i32 = arith.constant 0 : i32
    %c0_i32_0 = arith.constant 0 : i32
    %c0_i32_1 = arith.constant 0 : i32
    return %c0_i32, %c0_i32_0 : i32, i32
  }
  func.func @transform_9(%arg0: i32) -> (i32, i32) {
    %c0_i32 = arith.constant 0 : i32
    %c0_i32_0 = arith.constant 0 : i32
    %c0_i32_1 = arith.constant 0 : i32
    return %c0_i32, %c0_i32_0 : i32, i32
  }
  func.func @transform_10(%arg0: i32) -> (i32, i32) {
    %c0_i32 = arith.constant 0 : i32
    %c0_i32_0 = arith.constant 0 : i32
    %c0_i32_1 = arith.constant 0 : i32
    return %c0_i32, %c0_i32_0 : i32, i32
  }
  func.func @transform_11(%arg0: i32) -> (i32, i32, i32) {
    %c0_i32 = arith.constant 0 : i32
    %c0_i32_0 = arith.constant 0 : i32
    %c0_i32_1 = arith.constant 0 : i32
    %c0_i32_2 = arith.constant 0 : i32
    return %c0_i32, %c0_i32_0, %c0_i32_1 : i32, i32, i32
  }
  func.func @transform_12(%arg0: i32) -> (i32, i32, i32) {
    %c0_i32 = arith.constant 0 : i32
    %c0_i32_0 = arith.constant 0 : i32
    %c0_i32_1 = arith.constant 0 : i32
    %c0_i32_2 = arith.constant 0 : i32
    return %c0_i32, %c0_i32_0, %c0_i32_1 : i32, i32, i32
  }
  func.func @transform_13(%arg0: i32) -> (i32, i32) {
    %c0_i32 = arith.constant 0 : i32
    %c0_i32_0 = arith.constant 0 : i32
    %c0_i32_1 = arith.constant 0 : i32
    return %c0_i32, %c0_i32_0 : i32, i32
  }
  func.func @transform_14(%arg0: i32) -> (i32, i32) {
    %c0_i32 = arith.constant 0 : i32
    %c0_i32_0 = arith.constant 0 : i32
    %c0_i32_1 = arith.constant 0 : i32
    return %c0_i32, %c0_i32_0 : i32, i32
  }
  func.func @transform_15(%arg0: i32) -> (i32, i32) {
    %c0_i32 = arith.constant 0 : i32
    %c0_i32_0 = arith.constant 0 : i32
    return %arg0, %c0_i32 : i32, i32
  }
  func.func @transform_16(%arg0: i32) -> (i32, i32) {
    %c0_i32 = arith.constant 0 : i32
    %c0_i32_0 = arith.constant 0 : i32
    return %arg0, %c0_i32 : i32, i32
  }
  func.func @transform_17(%arg0: i32) -> (i32, i32) {
    %c0_i32 = arith.constant 0 : i32
    %c0_i32_0 = arith.constant 0 : i32
    return %arg0, %c0_i32 : i32, i32
  }
}

</mosaic_0001>

<bundles_post_ra>
// kernel: tpu_custom_call.1
= control target key start
LH: loop header
LB: loop body
LE: loop exit
PB: predicated region body
PF: predicated region fallthrough
CT: control target
= control target key end

     0   :  { %s2286_s0 = inlined_call_operand.vmem [shape: f32[56,8], index: 0, kind: input, shape index: {}]   ;;  %s2287_s1 = inlined_call_operand.vmem [shape: bf16[8,32], index: 1, kind: input, shape index: {}]   ;;  %s2288_s2 = inlined_call_operand.vmem [shape: f32[1,32], index: 2, kind: input, shape index: {}]   ;;  %s2289_s3 = inlined_call_operand.vmem [shape: bf16[2,32,32], index: 3, kind: input, shape index: {}]   ;;  %s2290_s4 = inlined_call_operand.vmem [shape: f32[2,1,32], index: 4, kind: input, shape index: {}]   ;;  %s2291_s5 = inlined_call_operand.hbm [shape: bf16[32,64], index: 5, kind: input, shape index: {}]   ;;  %s2292_s6 = inlined_call_operand.vmem [shape: f32[1,64], index: 6, kind: input, shape index: {}]   ;;  %s2293_s7 = inlined_call_operand.vmem [shape: f32[64,128], index: 7, kind: input, shape index: {}]   ;;  %s2294_s8 = inlined_call_operand.vmem [shape: f32[1,128], index: 8, kind: input, shape index: {}]   ;;  %s2295_s9 = inlined_call_operand.vmem [shape: bf16[128,32], index: 9, kind: input, shape index: {}]   ;;  %s2296_s10 = inlined_call_operand.vmem [shape: f32[1,32], index: 10, kind: input, shape index: {}]   ;;  %s2297_s11 = inlined_call_operand.vmem [shape: bf16[2,32,32], index: 11, kind: input, shape index: {}]   ;;  %s2298_s12 = inlined_call_operand.vmem [shape: f32[2,1,32], index: 12, kind: input, shape index: {}]   ;;  %s2299_s13 = inlined_call_operand.vmem [shape: bf16[32,8], index: 13, kind: input, shape index: {}]   ;;  %s2300_s14 = inlined_call_operand.vmem [shape: f32[1,8], index: 14, kind: input, shape index: {}]   ;;  %s2301_s15 = inlined_call_operand.vmem [shape: f32[56,8], index: 15, kind: output, shape index: {0}]   ;;  %s2302_s16 = inlined_call_operand.hbm [shape: s32[56,128], index: 16, kind: output, shape index: {1}]   ;;  %s2303_s17 = inlined_call_operand.hbm [shape: f32[1,1], index: 17, kind: output, shape index: {2}]  }
   0x1   :  { %2305 = sst [smem:[#allocation11_spill]] %s2286_s0 }
   0x2   :  { %2306 = sst [smem:[#allocation12_spill]] %s2287_s1 }
   0x3   :  { %23 = vsyncpa [#allocation3], 0 }
   0x4   :  { %24 = vsyncpa [#allocation4], 0 }
   0x5   :  { %25 = vsyncpa [#allocation5], 0  ;;  %s40_s26 = sshll.u32 %s2291_s5, 4  ;;  %s1608_s27 = smov [#allocation2]   ;;  %s41_s26 = int_to_ptr.hbm [resolvable:$true] %s40_s26 }
   0x6   :  { %s42_s28 = sshll.u32 %s1608_s27, 4  ;;  %s1609_s29 = smov 64   ;;  %s43_s28 = int_to_ptr.vmem [resolvable:$true] %s42_s28 }
   0x7   :  { %s1610_s0 = smov 4  }
   0x8   :  { %48 = dma.hbm_to_vmem [thread:$0]  %s41_s26, 256, %s43_s28, [#allocation3], %s1609_s29, %s1609_s29, %s1610_s0  }
   0x9   :  { %1602 = dma.done.wait [#allocation3], 256  }
   0xa   :  { %1603 = vsyncadd [#allocation3], 4294967040  ;;  %vm101_vm0 = vcmask 1043456   ;;  %s2307_s19 = sld [smem:[#allocation12_spill]]  ;;  %vm88_vm1 = vcmask 64512   ;;  %v1471_v11 = vld [vmem:[%s2289_s3 + $0x8] sm:$0xff] }
   0xb   :  { %s2308_s21 = sld [smem:[#allocation11_spill]]  ;;  %v1470_v14 = vld [vmem:[%s2289_s3] sm:$0xff]  ;;  %vm164_vm2 = vcmask 261120   ;;  %v1473_v42 = vld [vmem:[%s2289_s3 + $0x18] sm:$0xff]  ;;  %v1472_v43 = vld [vmem:[%s2289_s3 + $0x10] sm:$0xff]  ;;  %vm372_vm3 = vcmask 523264  }
   0xc   :  { %v1526_v16 = vld [vmem:[%s2288_s2] ss:$0 sm:$0xff]  ;;  %s1611_s18 = smov 113   ;;  %s1614_s1 = smov 2  }
   0xd   :  { %v1527_v45 = vld [vmem:[%s2290_s4] ss:$0 sm:$0xff]  ;;  %s1615_s20 = smov 116   ;;  %s1616_s5 = smov 120  }
   0xe   :  { %s1617_s22 = smov 8  }
  0x10   :  { %v79_v0 = vld [vmem:[%s2307_s19] sm:$0xf]  ;;  %s1612_s19 = smov 1  }
  0x11   :  { %v72_v1 = vld [vmem:[%s2308_s21] sm:$0xff]  ;;  %v73_v2 = vld [vmem:[%s2308_s21 + $0x8] sm:$0xff]  ;;  %v103_v3 = vsel %vm101_vm0, %v79_v0, 0  ;;  %v74_v5 = vld [vmem:[%s2308_s21 + $0x10] sm:$0xff] }
  0x12   :  { %v81_v4 = vpack.c.bf16 %v73_v2, %v72_v1  ;;  %v75_v6 = vld [vmem:[%s2308_s21 + $0x18] sm:$0xff]  ;;  %v76_v7 = vld [vmem:[%s2308_s21 + $0x20] sm:$0xff]  ;;  %112 = vmatpush.bf16.msra.mxu0 %v103_v3  ;;  %1490 = vmatpush.bf16.msra.mxu1 %v103_v3  ;;  %v77_v9 = vld [vmem:[%s2308_s21 + $0x28] sm:$0xff] }
  0x13   :  { %v82_v8 = vpack.c.bf16 %v75_v6, %v74_v5  ;;  %v78_v10 = vld [vmem:[%s2308_s21 + $0x30] sm:$0xff]  ;;  %1491 = vmatpush.bf16.msra.mxu2 %v103_v3  ;;  %v83_v12 = vpack.c.bf16 %v77_v9, %v76_v7  ;;  %1492 = vmatpush.bf16.msra.mxu3 %v103_v3 }
  0x14   :  { %v84_v13 = vpack.c.bf16 %v78_v10, %v78_v10 }
  0x15   :  { %1330 = vmatmul.msk.bf16.vlgmr.msra.gmra.mxu0 %vm88_vm1, %v81_v4  ;;  %1331 = vmatmul.msk.bf16.vlgmr.msra.gmra.mxu1 %vm88_vm1, %v82_v8 }
  0x16   :  { %183 = vmatpush.bf16.msrb.mxu1 %v1471_v11  ;;  %1332 = vmatmul.msk.bf16.vlgmr.msra.gmra.mxu2 %vm88_vm1, %v83_v12 }
  0x17   :  { %1333 = vmatmul.msk.bf16.vlgmr.msra.gmra.mxu3 %vm88_vm1, %v84_v13  ;;  %263 = vmatpush.bf16.msrb.mxu2 %v1473_v42 }
  0x1a   :  { %184 = vmatpush.bf16.msrb.mxu1 %v1470_v14  ;;  %v1475_v14 = vld [vmem:[#allocation2 + $0x8] sm:$0xff] }
  0x1b   :  { %264 = vmatpush.bf16.msrb.mxu2 %v1472_v43  ;;  %341 = vmatpush.bf16.msrb.mxu3 %v1475_v14 }
  0x92   :  { %v114_v15 = vpop.f32.mrf.mxu0  ;;  %v119_v19 = vpop.f32.mrf.mxu1 }
  0x93   :  { %v115_v17 = vadd.f32 %v1526_v16, %v114_v15  ;;  %v120_v26 = vadd.f32 %v1526_v16, %v119_v19  ;;  %v1474_v15 = vld [vmem:[#allocation2] sm:$0xff] }
  0x94   :  { %342 = vmatpush.bf16.msrb.mxu3 %v1474_v15 }
  0x95   :  { %v133_v21 = vmax.f32 %v115_v17, 0.0  ;;  %v135_v30 = vmax.f32 %v120_v26, 0.0  ;;  %v1528_v17 = vld [vmem:[%s2290_s4 + $0x1] ss:$0 sm:$0xff] }
  0x99   :  { %v124_v28 = vpop.f32.mrf.mxu2 }
  0x9a   :  { %v116_v18 = vpop.f32.mrf.mxu0  ;;  %v129_v24 = vpop.f32.mrf.mxu3  ;;  %v125_v34 = vadd.f32 %v1526_v16, %v124_v28 }
  0x9b   :  { %v117_v20 = vadd.f32 %v1526_v16, %v116_v18  ;;  %v121_v25 = vpop.f32.mrf.mxu1  ;;  %v130_v39 = vadd.f32 %v1526_v16, %v129_v24 }
  0x9c   :  { %v122_v27 = vadd.f32 %v1526_v16, %v121_v25  ;;  %v137_v36 = vmax.f32 %v125_v34, 0.0 }
  0x9d   :  { %v134_v22 = vmax.f32 %v117_v20, 0.0  ;;  %v139_v40 = vmax.f32 %v130_v39, 0.0 }
  0x9e   :  { %v136_v31 = vmax.f32 %v122_v27, 0.0 }
  0x9f   :  { %v145_v23 = vpack.c.bf16 %v134_v22, %v133_v21  ;;  %v148_v41 = vpack.c.bf16 %v139_v40, %v139_v40 }
  0xa0   :  { %v146_v32 = vpack.c.bf16 %v136_v31, %v135_v30 }
  0xa1   :  { %1342 = vmatmul.msk.bf16.vlgmr.msrb.gmra.mxu1 %vm164_vm2, %v145_v23  ;;  %v126_v33 = vpop.f32.mrf.mxu2 }
  0xa2   :  { %v131_v29 = vpop.f32.mrf.mxu3  ;;  %v127_v35 = vadd.f32 %v1526_v16, %v126_v33 }
  0xa4   :  { %v138_v37 = vmax.f32 %v127_v35, 0.0 }
  0xa6   :  { %v147_v38 = vpack.c.bf16 %v138_v37, %v137_v36 }
  0xb1   :  { %1343 = vmatmul.msk.bf16.gmra.mxu1 %vm164_vm2, %v146_v32 }
  0xc1   :  { %1344 = vmatmul.msk.bf16.gmra.mxu1 %vm164_vm2, %v147_v38  ;;  %v369_v38 = vld [vmem:[%s2293_s7 + $0x28] sm:$0xff] }
  0xd1   :  { %1345 = vmatmul.msk.bf16.gmra.mxu1 %vm164_vm2, %v148_v41  ;;  %v367_v41 = vld [vmem:[%s2293_s7 + $0x18] sm:$0xff] }
 0x11e   :  { %v186_v44 = vpop.f32.mrf.mxu1 }
 0x11f   :  { %v187_v46 = vadd.f32 %v1527_v45, %v186_v44 }
 0x121   :  { %v205_v48 = vmax.f32 %v187_v46, 0.0 }
 0x123   :  { %v212_v51 = vadd.f32 %v205_v48, %v133_v21 }
 0x126   :  { %v188_v47 = vpop.f32.mrf.mxu1 }
 0x127   :  { %v189_v49 = vadd.f32 %v1527_v45, %v188_v47  ;;  %v365_v47 = vld [vmem:[%s2293_s7 + $0x8] sm:$0xff] }
 0x129   :  { %v206_v50 = vmax.f32 %v189_v49, 0.0 }
 0x12b   :  { %v213_v52 = vadd.f32 %v206_v50, %v134_v22 }
 0x12d   :  { %v226_v53 = vpack.c.bf16 %v213_v52, %v212_v51 }
 0x12e   :  { %v191_v54 = vpop.f32.mrf.mxu1 }
 0x12f   :  { %1359 = vmatmul.msk.bf16.vlgmr.msrb.gmra.mxu2 %vm164_vm2, %v226_v53  ;;  %v192_v55 = vadd.f32 %v1527_v45, %v191_v54 }
 0x131   :  { %v207_v57 = vmax.f32 %v192_v55, 0.0 }
 0x133   :  { %v214_v60 = vadd.f32 %v207_v57, %v135_v30  ;;  %v364_v57 = vld [vmem:[%s2293_s7] sm:$0xff] }
 0x136   :  { %v193_v56 = vpop.f32.mrf.mxu1 }
 0x137   :  { %v194_v58 = vadd.f32 %v1527_v45, %v193_v56 }
 0x139   :  { %v208_v59 = vmax.f32 %v194_v58, 0.0  ;;  %v1529_v58 = vld [vmem:[%s2292_s6] ss:$0 sm:$0xff] }
 0x13b   :  { %v215_v61 = vadd.f32 %v208_v59, %v136_v31 }
 0x13d   :  { %v227_v62 = vpack.c.bf16 %v215_v61, %v214_v60 }
 0x13e   :  { %v196_v63 = vpop.f32.mrf.mxu1 }
 0x13f   :  { %1360 = vmatmul.msk.bf16.gmra.mxu2 %vm164_vm2, %v227_v62  ;;  %v197_v0 = vadd.f32 %v1527_v45, %v196_v63 }
 0x141   :  { %v209_v2 = vmax.f32 %v197_v0, 0.0 }
 0x143   :  { %v216_v5 = vadd.f32 %v209_v2, %v137_v36  ;;  %v371_v36 = vld [vmem:[%s2293_s7 + $0x38] sm:$0xff] }
 0x144   :  { %402 = vmatpush.msrb.mxu0 %v371_v36 }
 0x146   :  { %v198_v1 = vpop.f32.mrf.mxu1 }
 0x147   :  { %v199_v3 = vadd.f32 %v1527_v45, %v198_v1 }
 0x149   :  { %v210_v4 = vmax.f32 %v199_v3, 0.0 }
 0x14b   :  { %v217_v6 = vadd.f32 %v210_v4, %v138_v37  ;;  %v370_v37 = vld [vmem:[%s2293_s7 + $0x30] sm:$0xff] }
 0x14c   :  { %403 = vmatpush.msrb.mxu0 %v370_v37 }
 0x14d   :  { %v228_v7 = vpack.c.bf16 %v217_v6, %v216_v5 }
 0x14e   :  { %v201_v8 = vpop.f32.mrf.mxu1  ;;  %404 = vmatpush.msrb.mxu0 %v369_v38 }
 0x14f   :  { %1361 = vmatmul.msk.bf16.gmra.mxu2 %vm164_vm2, %v228_v7  ;;  %v202_v9 = vadd.f32 %v1527_v45, %v201_v8  ;;  %v366_v45 = vld [vmem:[%s2293_s7 + $0x10] sm:$0xff] }
 0x151   :  { %v211_v10 = vmax.f32 %v202_v9, 0.0 }
 0x153   :  { %v218_v12 = vadd.f32 %v211_v10, %v139_v40  ;;  %v368_v40 = vld [vmem:[%s2293_s7 + $0x20] sm:$0xff]  ;;  %s1620_s7 = smov [#allocation6]  }
 0x154   :  { %405 = vmatpush.msrb.mxu0 %v368_v40  ;;  %v1815_v10 = vld [vmem:[%s2294_s8] ss:$0 sm:$0xff]  ;;  %s1613_s8 = smov 114  }
 0x155   :  { %v229_v13 = vpack.c.bf16 %v218_v12, %v218_v12 }
 0x156   :  { %v203_v11 = vpop.f32.mrf.mxu1  ;;  %406 = vmatpush.msrb.mxu0 %v367_v41 }
 0x158   :  { %407 = vmatpush.msrb.mxu0 %v366_v45 }
 0x15a   :  { %408 = vmatpush.msrb.mxu0 %v365_v47 }
 0x15c   :  { %409 = vmatpush.msrb.mxu0 %v364_v57 }
 0x15f   :  { %1362 = vmatmul.msk.bf16.gmra.mxu2 %vm164_vm2, %v229_v13 }
 0x1b2   :  { %v266_v16 = vpop.f32.mrf.mxu2 }
 0x1b3   :  { %v267_v18 = vadd.f32 %v1528_v17, %v266_v16 }
 0x1b5   :  { %v285_v20 = vmax.f32 %v267_v18, 0.0 }
 0x1b7   :  { %v292_v23 = vadd.f32 %v285_v20, %v212_v51 }
 0x1ba   :  { %v268_v19 = vpop.f32.mrf.mxu2 }
 0x1bb   :  { %v269_v21 = vadd.f32 %v1528_v17, %v268_v19 }
 0x1bd   :  { %v286_v22 = vmax.f32 %v269_v21, 0.0 }
 0x1bf   :  { %v293_v24 = vadd.f32 %v286_v22, %v213_v52 }
 0x1c1   :  { %v304_v25 = vpack.c.bf16 %v293_v24, %v292_v23 }
 0x1c2   :  { %v271_v26 = vpop.f32.mrf.mxu2 }
 0x1c3   :  { %1371 = vmatmul.msk.bf16.vlgmr.msrb.gmra.mxu3 %vm164_vm2, %v304_v25  ;;  %v272_v27 = vadd.f32 %v1528_v17, %v271_v26 }
 0x1c5   :  { %v287_v29 = vmax.f32 %v272_v27, 0.0 }
 0x1c7   :  { %v294_v32 = vadd.f32 %v287_v29, %v214_v60  ;;  %v449_v29 = vlaneseq }
 0x1ca   :  { %v273_v28 = vpop.f32.mrf.mxu2 }
 0x1cb   :  { %v274_v30 = vadd.f32 %v1528_v17, %v273_v28 }
 0x1cd   :  { %v288_v31 = vmax.f32 %v274_v30, 0.0  ;;  %v450_v30 = vand.u32 127, %v449_v29 }
 0x1cf   :  { %v295_v33 = vadd.f32 %v288_v31, %v215_v61  ;;  %v1860_v31 = vand.u32 15, %v450_v30 }
 0x1d1   :  { %v305_v34 = vpack.c.bf16 %v295_v33, %v294_v32  ;;  %vm492_vm4 = vcmp.ge.s32.totalorder %v1860_v31, 1  ;;  %vm535_vm5 = vcmp.ge.s32.totalorder %v1860_v31, 2  ;;  %vm578_vm6 = vcmp.ge.s32.totalorder %v1860_v31, 4 }
 0x1d2   :  { %v276_v35 = vpop.f32.mrf.mxu2  ;;  %vm621_vm7 = vcmp.ge.s32.totalorder %v1860_v31, 8 }
 0x1d3   :  { %1372 = vmatmul.msk.bf16.gmra.mxu3 %vm164_vm2, %v305_v34  ;;  %v277_v39 = vadd.f32 %v1528_v17, %v276_v35 }
 0x1d5   :  { %v289_v43 = vmax.f32 %v277_v39, 0.0 }
 0x1d7   :  { %v296_v48 = vadd.f32 %v289_v43, %v216_v5 }
 0x1da   :  { %v278_v42 = vpop.f32.mrf.mxu2 }
 0x1db   :  { %v279_v44 = vadd.f32 %v1528_v17, %v278_v42 }
 0x1dd   :  { %v290_v46 = vmax.f32 %v279_v44, 0.0 }
 0x1df   :  { %v297_v49 = vadd.f32 %v290_v46, %v217_v6 }
 0x1e1   :  { %v306_v50 = vpack.c.bf16 %v297_v49, %v296_v48 }
 0x1e2   :  { %v281_v51 = vpop.f32.mrf.mxu2 }
 0x1e3   :  { %1373 = vmatmul.msk.bf16.gmra.mxu3 %vm164_vm2, %v306_v50  ;;  %v282_v52 = vadd.f32 %v1528_v17, %v281_v51 }
 0x1e5   :  { %v291_v53 = vmax.f32 %v282_v52, 0.0 }
 0x1e7   :  { %v298_v55 = vadd.f32 %v291_v53, %v218_v12 }
 0x1e9   :  { %v307_v56 = vpack.c.bf16 %v298_v55, %v298_v55 }
 0x1ea   :  { %v283_v54 = vpop.f32.mrf.mxu2 }
 0x1f3   :  { %1374 = vmatmul.msk.bf16.gmra.mxu3 %vm164_vm2, %v307_v56 }
 0x246   :  { %v344_v59 = vpop.f32.mrf.mxu3 }
 0x247   :  { %v345_v60 = vadd.f32 %v1529_v58, %v344_v59 }
 0x249   :  { %1375 = vmatmul.msk.f32.vlgmr.msrb.gmra.mxu0 %vm372_vm3, %v345_v60 }
 0x24e   :  { %v346_v61 = vpop.f32.mrf.mxu3 }
 0x24f   :  { %v347_v62 = vadd.f32 %v1529_v58, %v346_v61 }
 0x251   :  { %1376 = vmatmul.msk.f32.gmra.mxu0 %vm372_vm3, %v347_v62 }
 0x256   :  { %v349_v63 = vpop.f32.mrf.mxu3 }
 0x257   :  { %v350_v0 = vadd.f32 %v1529_v58, %v349_v63 }
 0x259   :  { %1377 = vmatmul.msk.f32.gmra.mxu0 %vm372_vm3, %v350_v0 }
 0x25e   :  { %v351_v1 = vpop.f32.mrf.mxu3 }
 0x25f   :  { %v352_v2 = vadd.f32 %v1529_v58, %v351_v1 }
 0x261   :  { %1378 = vmatmul.msk.f32.gmra.mxu0 %vm372_vm3, %v352_v2 }
 0x266   :  { %v354_v3 = vpop.f32.mrf.mxu3 }
 0x267   :  { %v355_v4 = vadd.f32 %v1529_v58, %v354_v3 }
 0x269   :  { %1379 = vmatmul.msk.f32.gmra.mxu0 %vm372_vm3, %v355_v4 }
 0x26e   :  { %v356_v5 = vpop.f32.mrf.mxu3 }
 0x26f   :  { %v357_v6 = vadd.f32 %v1529_v58, %v356_v5 }
 0x271   :  { %1380 = vmatmul.msk.f32.gmra.mxu0 %vm372_vm3, %v357_v6 }
 0x276   :  { %v359_v7 = vpop.f32.mrf.mxu3 }
 0x277   :  { %v360_v8 = vadd.f32 %v1529_v58, %v359_v7 }
 0x279   :  { %1381 = vmatmul.msk.f32.gmra.mxu0 %vm372_vm3, %v360_v8 }
 0x27e   :  { %v361_v9 = vpop.f32.mrf.mxu3 }
 0x2c6   :  { %v411_v11 = vpop.f32.mrf.mxu0 }
 0x2c7   :  { %v432_v12 = vmul.f32 2.0, %v411_v11 }
 0x2c9   :  { %v1818_v13 = vsub.f32 %v1815_v10, %v432_v12 }
 0x2cb   :  { %478 = vrot.lane.b32.xlu1 %v1818_v13, %s1611_s18  ;;  %464 = vrot.lane.b32.xlu0 %v1818_v13, %s1612_s19 }
 0x2ce   :  { %v414_v14 = vpop.f32.mrf.mxu0 }
 0x2cf   :  { %v433_v15 = vmul.f32 2.0, %v414_v14 }
 0x2d1   :  { %v1825_v16 = vsub.f32 %v1815_v10, %v433_v15 }
 0x2d3   :  { %480 = vrot.lane.b32.xlu1 %v1825_v16, %s1611_s18  ;;  %466 = vrot.lane.b32.xlu0 %v1825_v16, %s1612_s19 }
 0x2d6   :  { %v417_v17 = vpop.f32.mrf.mxu0 }
 0x2d7   :  { %v434_v18 = vmul.f32 2.0, %v417_v17 }
 0x2d9   :  { %v1832_v19 = vsub.f32 %v1815_v10, %v434_v18 }
 0x2db   :  { %482 = vrot.lane.b32.xlu0 %v1832_v19, %s1611_s18  ;;  %468 = vrot.lane.b32.xlu2 %v1832_v19, %s1612_s19 }
 0x2de   :  { %v420_v20 = vpop.f32.mrf.mxu0 }
 0x2df   :  { %v435_v21 = vmul.f32 2.0, %v420_v20 }
 0x2e1   :  { %v1839_v22 = vsub.f32 %v1815_v10, %v435_v21 }
 0x2e3   :  { %484 = vrot.lane.b32.xlu1 %v1839_v22, %s1611_s18  ;;  %470 = vrot.lane.b32.xlu2 %v1839_v22, %s1612_s19 }
 0x2e6   :  { %v423_v23 = vpop.f32.mrf.mxu0 }
 0x2e7   :  { %v436_v24 = vmul.f32 2.0, %v423_v23 }
 0x2e9   :  { %v1846_v25 = vsub.f32 %v1815_v10, %v436_v24 }
 0x2eb   :  { %486 = vrot.lane.b32.xlu1 %v1846_v25, %s1611_s18  ;;  %472 = vrot.lane.b32.xlu2 %v1846_v25, %s1612_s19 }
 0x2ee   :  { %v426_v26 = vpop.f32.mrf.mxu0 }
 0x2ef   :  { %v437_v27 = vmul.f32 2.0, %v426_v26 }
 0x2f1   :  { %v1853_v28 = vsub.f32 %v1815_v10, %v437_v27 }
 0x2f3   :  { %488 = vrot.lane.b32.xlu2 %v1853_v28, %s1611_s18  ;;  %474 = vrot.lane.b32.xlu0 %v1853_v28, %s1612_s19 }
 0x2f6   :  { %v429_v44 = vpop.f32.mrf.mxu0 }
 0x2f7   :  { %v438_v46 = vmul.f32 2.0, %v429_v44 }
 0x2f9   :  { %v1882_v50 = vsub.f32 %v1815_v10, %v438_v46 }
 0x335   :  { %v469_v39 = vpop.permute.xlu2 %468 }
 0x33d   :  { %v479_v32 = vpop.permute.xlu1 %478  ;;  %v465_v33 = vpop.permute.xlu0 %464 }
 0x33e   :  { %v493_v34 = vsel %vm492_vm4, %v465_v33, %v479_v32  ;;  %v471_v45 = vpop.permute.xlu2 %470 }
 0x33f   :  { %v500_v35 = vmin.f32 %v1818_v13, %v493_v34 }
 0x341   :  { %521 = vrot.lane.b32.xlu2 %v500_v35, %s1613_s8  ;;  %507 = vrot.lane.b32.xlu0 %v500_v35, %s1614_s1 }
 0x345   :  { %v481_v36 = vpop.permute.xlu1 %480  ;;  %v467_v37 = vpop.permute.xlu0 %466 }
 0x346   :  { %v494_v38 = vsel %vm492_vm4, %v467_v37, %v481_v36  ;;  %v473_v51 = vpop.permute.xlu2 %472 }
 0x347   :  { %v501_v40 = vmin.f32 %v1825_v16, %v494_v38 }
 0x349   :  { %509 = vrot.lane.b32.xlu1 %v501_v40, %s1614_s1  ;;  %523 = vrot.lane.b32.xlu0 %v501_v40, %s1613_s8 }
 0x34d   :  { %v483_v41 = vpop.permute.xlu0 %482 }
 0x34e   :  { %v495_v42 = vsel %vm492_vm4, %v469_v39, %v483_v41  ;;  %v489_v55 = vpop.permute.xlu2 %488 }
 0x34f   :  { %v502_v43 = vmin.f32 %v1832_v19, %v495_v42 }
 0x351   :  { %511 = vrot.lane.b32.xlu1 %v502_v43, %s1614_s1  ;;  %525 = vrot.lane.b32.xlu0 %v502_v43, %s1613_s8 }
 0x355   :  { %v485_v47 = vpop.permute.xlu1 %484 }
 0x356   :  { %v496_v48 = vsel %vm492_vm4, %v471_v45, %v485_v47 }
 0x357   :  { %v503_v49 = vmin.f32 %v1839_v22, %v496_v48 }
 0x359   :  { %527 = vrot.lane.b32.xlu1 %v503_v49, %s1613_s8  ;;  %513 = vrot.lane.b32.xlu2 %v503_v49, %s1614_s1 }
 0x35a   :  { %490 = vrot.lane.b32.xlu0 %v1882_v50, %s1611_s18 }
 0x35d   :  { %v487_v52 = vpop.permute.xlu1 %486 }
 0x35e   :  { %v497_v53 = vsel %vm492_vm4, %v473_v51, %v487_v52 }
 0x35f   :  { %v504_v54 = vmin.f32 %v1846_v25, %v497_v53 }
 0x361   :  { %515 = vrot.lane.b32.xlu1 %v504_v54, %s1614_s1  ;;  %476 = vrot.lane.b32.xlu2 %v1882_v50, %s1612_s19 }
 0x362   :  { %529 = vrot.lane.b32.xlu0 %v504_v54, %s1613_s8 }
 0x365   :  { %v475_v56 = vpop.permute.xlu0 %474 }
 0x366   :  { %v498_v57 = vsel %vm492_vm4, %v475_v56, %v489_v55 }
 0x367   :  { %v505_v58 = vmin.f32 %v1853_v28, %v498_v57 }
 0x369   :  { %531 = vrot.lane.b32.xlu1 %v505_v58, %s1613_s8  ;;  %517 = vrot.lane.b32.xlu2 %v505_v58, %s1614_s1 }
 0x39b   :  { %v522_v59 = vpop.permute.xlu2 %521 }
 0x3b3   :  { %v508_v60 = vpop.permute.xlu0 %507  ;;  %v514_v3 = vpop.permute.xlu2 %513 }
 0x3b4   :  { %v536_v61 = vsel %vm535_vm5, %v508_v60, %v522_v59 }
 0x3b5   :  { %v543_v62 = vmin.f32 %v500_v35, %v536_v61 }
 0x3b7   :  { %564 = vrot.lane.b32.xlu1 %v543_v62, %s1615_s20  ;;  %550 = vrot.lane.b32.xlu2 %v543_v62, %s1610_s0 }
 0x3bb   :  { %v510_v63 = vpop.permute.xlu1 %509  ;;  %v524_v0 = vpop.permute.xlu0 %523 }
 0x3bc   :  { %v537_v1 = vsel %vm535_vm5, %v510_v63, %v524_v0  ;;  %v477_v9 = vpop.permute.xlu2 %476 }
 0x3bd   :  { %v544_v2 = vmin.f32 %v501_v40, %v537_v1 }
 0x3bf   :  { %552 = vrot.lane.b32.xlu0 %v544_v2, %s1610_s0  ;;  %566 = vrot.lane.b32.xlu2 %v544_v2, %s1615_s20 }
 0x3c3   :  { %v512_v4 = vpop.permute.xlu1 %511  ;;  %v526_v5 = vpop.permute.xlu0 %525 }
 0x3c4   :  { %v538_v6 = vsel %vm535_vm5, %v512_v4, %v526_v5  ;;  %v518_v23 = vpop.permute.xlu2 %517 }
 0x3c5   :  { %v545_v7 = vmin.f32 %v502_v43, %v538_v6 }
 0x3c7   :  { %554 = vrot.lane.b32.xlu0 %v545_v7, %s1610_s0  ;;  %568 = vrot.lane.b32.xlu2 %v545_v7, %s1615_s20 }
 0x3cb   :  { %v528_v8 = vpop.permute.xlu1 %527 }
 0x3cc   :  { %v539_v10 = vsel %vm535_vm5, %v514_v3, %v528_v8  ;;  %v491_v11 = vpop.permute.xlu0 %490 }
 0x3cd   :  { %v546_v12 = vmin.f32 %v503_v49, %v539_v10  ;;  %v499_v14 = vsel %vm492_vm4, %v477_v9, %v491_v11 }
 0x3ce   :  { %v506_v15 = vmin.f32 %v1882_v50, %v499_v14 }
 0x3cf   :  { %556 = vrot.lane.b32.xlu1 %v546_v12, %s1610_s0  ;;  %570 = vrot.lane.b32.xlu0 %v546_v12, %s1615_s20 }
 0x3d0   :  { %533 = vrot.lane.b32.xlu2 %v506_v15, %s1613_s8 }
 0x3d3   :  { %v516_v17 = vpop.permute.xlu1 %515 }
 0x3d4   :  { %v530_v18 = vpop.permute.xlu0 %529 }
 0x3d5   :  { %v540_v20 = vsel %vm535_vm5, %v516_v17, %v530_v18 }
 0x3d6   :  { %v547_v21 = vmin.f32 %v504_v54, %v540_v20 }
 0x3d7   :  { %519 = vrot.lane.b32.xlu1 %v506_v15, %s1614_s1 }
 0x3d8   :  { %558 = vrot.lane.b32.xlu0 %v547_v21, %s1610_s0  ;;  %572 = vrot.lane.b32.xlu2 %v547_v21, %s1615_s20 }
 0x3db   :  { %v532_v24 = vpop.permute.xlu1 %531 }
 0x3dc   :  { %v541_v26 = vsel %vm535_vm5, %v518_v23, %v532_v24 }
 0x3dd   :  { %v548_v27 = vmin.f32 %v505_v58, %v541_v26 }
 0x3df   :  { %560 = vrot.lane.b32.xlu1 %v548_v27, %s1610_s0 }
 0x3e0   :  { %574 = vrot.lane.b32.xlu0 %v548_v27, %s1615_s20 }
 0x411   :  { %v551_v30 = vpop.permute.xlu2 %550 }
 0x419   :  { %v567_v35 = vpop.permute.xlu2 %566 }
 0x421   :  { %v569_v39 = vpop.permute.xlu2 %568 }
 0x429   :  { %v565_v32 = vpop.permute.xlu1 %564 }
 0x42a   :  { %v579_v33 = vsel %vm578_vm6, %v551_v30, %v565_v32  ;;  %v534_v43 = vpop.permute.xlu2 %533 }
 0x42b   :  { %v586_v34 = vmin.f32 %v543_v62, %v579_v33  ;;  %v1961_v62 = vcvt.s32.f32 %v1860_v31 }
 0x42d   :  { %607 = vrot.lane.b32.xlu0 %v586_v34, %s1616_s5  ;;  %593 = vrot.lane.b32.xlu1 %v586_v34, %s1617_s22 }
 0x431   :  { %v553_v36 = vpop.permute.xlu0 %552 }
 0x432   :  { %v580_v37 = vsel %vm578_vm6, %v553_v36, %v567_v35  ;;  %v573_v49 = vpop.permute.xlu2 %572 }
 0x433   :  { %v587_v38 = vmin.f32 %v544_v2, %v580_v37 }
 0x435   :  { %609 = vrot.lane.b32.xlu1 %v587_v38, %s1616_s5  ;;  %595 = vrot.lane.b32.xlu2 %v587_v38, %s1617_s22 }
 0x439   :  { %v555_v40 = vpop.permute.xlu0 %554 }
 0x43a   :  { %v581_v41 = vsel %vm578_vm6, %v555_v40, %v569_v39 }
 0x43b   :  { %v588_v42 = vmin.f32 %v545_v7, %v581_v41 }
 0x43d   :  { %611 = vrot.lane.b32.xlu1 %v588_v42, %s1616_s5  ;;  %597 = vrot.lane.b32.xlu2 %v588_v42, %s1617_s22 }
 0x441   :  { %v557_v44 = vpop.permute.xlu1 %556  ;;  %v571_v45 = vpop.permute.xlu0 %570 }
 0x442   :  { %v582_v46 = vsel %vm578_vm6, %v557_v44, %v571_v45 }
 0x443   :  { %v589_v47 = vmin.f32 %v546_v12, %v582_v46 }
 0x445   :  { %599 = vrot.lane.b32.xlu0 %v589_v47, %s1617_s22  ;;  %613 = vrot.lane.b32.xlu2 %v589_v47, %s1616_s5 }
 0x449   :  { %v520_v48 = vpop.permute.xlu1 %519 }
 0x44a   :  { %v559_v51 = vpop.permute.xlu0 %558  ;;  %v542_v52 = vsel %vm535_vm5, %v520_v48, %v534_v43 }
 0x44b   :  { %v583_v53 = vsel %vm578_vm6, %v559_v51, %v573_v49  ;;  %v549_v54 = vmin.f32 %v506_v15, %v542_v52 }
 0x44c   :  { %v590_v55 = vmin.f32 %v547_v21, %v583_v53 }
 0x44d   :  { %576 = vrot.lane.b32.xlu1 %v549_v54, %s1615_s20  ;;  %562 = vrot.lane.b32.xlu0 %v549_v54, %s1610_s0 }
 0x44e   :  { %601 = vrot.lane.b32.xlu2 %v590_v55, %s1617_s22 }
 0x451   :  { %v561_v56 = vpop.permute.xlu1 %560 }
 0x452   :  { %v575_v57 = vpop.permute.xlu0 %574 }
 0x453   :  { %v584_v58 = vsel %vm578_vm6, %v561_v56, %v575_v57 }
 0x454   :  { %v591_v59 = vmin.f32 %v548_v27, %v584_v58 }
 0x455   :  { %615 = vrot.lane.b32.xlu1 %v590_v55, %s1616_s5 }
 0x456   :  { %603 = vrot.lane.b32.xlu0 %v591_v59, %s1617_s22  ;;  %617 = vrot.lane.b32.xlu2 %v591_v59, %s1616_s5 }
 0x48f   :  { %v596_v63 = vpop.permute.xlu2 %595 }
 0x497   :  { %v598_v6 = vpop.permute.xlu2 %597 }
 0x49f   :  { %v608_v60 = vpop.permute.xlu0 %607  ;;  %v594_v61 = vpop.permute.xlu1 %593 }
 0x4a0   :  { %v622_v0 = vsel %vm621_vm7, %v594_v61, %v608_v60  ;;  %v614_v10 = vpop.permute.xlu2 %613 }
 0x4a1   :  { %v629_v1 = vmin.f32 %v586_v34, %v622_v0 }
 0x4a3   :  { %vm636_vm8 = vcmp.eq.f32.partialorder %v1818_v13, %v629_v1 }
 0x4a4   :  { %v643_v2 = vsel %vm636_vm8, %v1961_v62, 16.0 }
 0x4a5   :  { %650 = vrot.lane.b32.xlu0 %v643_v2, %s1612_s19  ;;  %664 = vrot.lane.b32.xlu2 %v643_v2, %s1611_s18 }
 0x4a7   :  { %v610_v3 = vpop.permute.xlu1 %609 }
 0x4a8   :  { %v623_v4 = vsel %vm621_vm7, %v596_v63, %v610_v3 }
 0x4a9   :  { %v630_v5 = vmin.f32 %v587_v38, %v623_v4 }
 0x4ab   :  { %vm637_vm9 = vcmp.eq.f32.partialorder %v1825_v16, %v630_v5 }
 0x4ac   :  { %v644_v7 = vsel %vm637_vm9, %v1961_v62, 16.0 }
 0x4ad   :  { %666 = vrot.lane.b32.xlu0 %v644_v7, %s1611_s18  ;;  %652 = vrot.lane.b32.xlu1 %v644_v7, %s1612_s19 }
 0x4af   :  { %v612_v13 = vpop.permute.xlu1 %611 }
 0x4b0   :  { %v624_v8 = vsel %vm621_vm7, %v598_v6, %v612_v13 }
 0x4b1   :  { %v631_v9 = vmin.f32 %v588_v42, %v624_v8 }
 0x4b3   :  { %vm638_vm10 = vcmp.eq.f32.partialorder %v1832_v19, %v631_v9  ;;  %v602_v19 = vpop.permute.xlu2 %601 }
 0x4b4   :  { %v645_v11 = vsel %vm638_vm10, %v1961_v62, 16.0 }
 0x4b5   :  { %668 = vrot.lane.b32.xlu0 %v645_v11, %s1611_s18  ;;  %654 = vrot.lane.b32.xlu1 %v645_v11, %s1612_s19 }
 0x4b7   :  { %v600_v16 = vpop.permute.xlu0 %599 }
 0x4b8   :  { %v625_v12 = vsel %vm621_vm7, %v600_v16, %v614_v10 }
 0x4b9   :  { %v632_v14 = vmin.f32 %v589_v47, %v625_v12 }
 0x4bb   :  { %vm639_vm11 = vcmp.eq.f32.partialorder %v1839_v22, %v632_v14  ;;  %v618_v24 = vpop.permute.xlu2 %617 }
 0x4bc   :  { %v646_v15 = vsel %vm639_vm11, %v1961_v62, 16.0 }
 0x4bd   :  { %670 = vrot.lane.b32.xlu1 %v646_v15, %s1611_s18  ;;  %656 = vrot.lane.b32.xlu2 %v646_v15, %s1612_s19 }
 0x4bf   :  { %v577_v17 = vpop.permute.xlu1 %576  ;;  %v563_v18 = vpop.permute.xlu0 %562 }
 0x4c0   :  { %v585_v20 = vsel %vm578_vm6, %v563_v18, %v577_v17 }
 0x4c1   :  { %v592_v21 = vmin.f32 %v549_v54, %v585_v20 }
 0x4c3   :  { %619 = vrot.lane.b32.xlu0 %v592_v21, %s1616_s5 }
 0x4c5   :  { %605 = vrot.lane.b32.xlu2 %v592_v21, %s1617_s22 }
 0x4c7   :  { %v616_v23 = vpop.permute.xlu1 %615 }
 0x4c8   :  { %v604_v22 = vpop.permute.xlu0 %603  ;;  %v626_v26 = vsel %vm621_vm7, %v602_v19, %v616_v23 }
 0x4c9   :  { %v627_v27 = vsel %vm621_vm7, %v604_v22, %v618_v24  ;;  %v633_v30 = vmin.f32 %v590_v55, %v626_v26 }
 0x4ca   :  { %v634_v32 = vmin.f32 %v591_v59, %v627_v27 }
 0x4cb   :  { %vm640_vm12 = vcmp.eq.f32.partialorder %v1846_v25, %v633_v30 }
 0x4cc   :  { %v647_v33 = vsel %vm640_vm12, %v1961_v62, 16.0  ;;  %vm641_vm13 = vcmp.eq.f32.partialorder %v1853_v28, %v634_v32 }
 0x4cd   :  { %672 = vrot.lane.b32.xlu0 %v647_v33, %s1611_s18  ;;  %658 = vrot.lane.b32.xlu1 %v647_v33, %s1612_s19  ;;  %v648_v34 = vsel %vm641_vm13, %v1961_v62, 16.0 }
 0x4ce   :  { %660 = vrot.lane.b32.xlu2 %v648_v34, %s1612_s19 }
 0x4d5   :  { %674 = vrot.lane.b32.xlu1 %v648_v34, %s1611_s18 }
 0x4ff   :  { %v665_v35 = vpop.permute.xlu2 %664 }
 0x517   :  { %v651_v36 = vpop.permute.xlu0 %650  ;;  %v657_v45 = vpop.permute.xlu2 %656 }
 0x518   :  { %v678_v37 = vsel %vm492_vm4, %v651_v36, %v665_v35 }
 0x519   :  { %v685_v25 = vmin.f32 %v643_v2, %v678_v37 }
 0x51b   :  { %706 = vrot.lane.b32.xlu1 %v685_v25, %s1613_s8  ;;  %692 = vrot.lane.b32.xlu2 %v685_v25, %s1614_s1 }
 0x51f   :  { %v667_v28 = vpop.permute.xlu0 %666  ;;  %v653_v38 = vpop.permute.xlu1 %652 }
 0x520   :  { %v679_v39 = vsel %vm492_vm4, %v653_v38, %v667_v28  ;;  %v606_v49 = vpop.permute.xlu2 %605 }
 0x521   :  { %v686_v40 = vmin.f32 %v644_v7, %v679_v39 }
 0x523   :  { %694 = vrot.lane.b32.xlu0 %v686_v40, %s1614_s1  ;;  %708 = vrot.lane.b32.xlu2 %v686_v40, %s1613_s8 }
 0x527   :  { %v669_v41 = vpop.permute.xlu0 %668  ;;  %v655_v42 = vpop.permute.xlu1 %654 }
 0x528   :  { %v680_v43 = vsel %vm492_vm4, %v655_v42, %v669_v41  ;;  %v661_v59 = vpop.permute.xlu2 %660 }
 0x529   :  { %v687_v44 = vmin.f32 %v645_v11, %v680_v43 }
 0x52b   :  { %696 = vrot.lane.b32.xlu0 %v687_v44, %s1614_s1  ;;  %710 = vrot.lane.b32.xlu2 %v687_v44, %s1613_s8 }
 0x52f   :  { %v671_v46 = vpop.permute.xlu1 %670 }
 0x530   :  { %v681_v47 = vsel %vm492_vm4, %v657_v45, %v671_v46 }
 0x531   :  { %v688_v48 = vmin.f32 %v646_v15, %v681_v47 }
 0x533   :  { %712 = vrot.lane.b32.xlu0 %v688_v48, %s1613_s8  ;;  %698 = vrot.lane.b32.xlu1 %v688_v48, %s1614_s1 }
 0x535   :  { %v620_v51 = vpop.permute.xlu0 %619 }
 0x536   :  { %v628_v52 = vsel %vm621_vm7, %v606_v49, %v620_v51 }
 0x537   :  { %v635_v53 = vmin.f32 %v592_v21, %v628_v52 }
 0x539   :  { %vm642_vm14 = vcmp.eq.f32.partialorder %v1882_v50, %v635_v53 }
 0x53a   :  { %v649_v54 = vsel %vm642_vm14, %v1961_v62, 16.0 }
 0x53b   :  { %676 = vrot.lane.b32.xlu2 %v649_v54, %s1611_s18  ;;  %662 = vrot.lane.b32.xlu1 %v649_v54, %s1612_s19  ;;  %s1298_s18 = sshll.u32 %s1620_s7, 4  ;;  %s1299_s18 = int_to_ptr.vmem [resolvable:$true] %s1298_s18 }
 0x53f   :  { %v673_v55 = vpop.permute.xlu0 %672  ;;  %v659_v56 = vpop.permute.xlu1 %658 }
 0x540   :  { %v682_v57 = vsel %vm492_vm4, %v659_v56, %v673_v55 }
 0x541   :  { %v689_v58 = vmin.f32 %v647_v33, %v682_v57 }
 0x543   :  { %700 = vrot.lane.b32.xlu0 %v689_v58, %s1614_s1  ;;  %714 = vrot.lane.b32.xlu2 %v689_v58, %s1613_s8 }
 0x547   :  { %v675_v60 = vpop.permute.xlu1 %674 }
 0x548   :  { %v683_v50 = vsel %vm492_vm4, %v661_v59, %v675_v60  ;;  %v1482_v59 = vld [vmem:[%s2295_s9 + $0x30] sm:$0xff]  ;;  %v1481_v60 = vld [vmem:[%s2295_s9 + $0x28] sm:$0xff] }
 0x549   :  { %v690_v61 = vmin.f32 %v648_v34, %v683_v50  ;;  %v1480_v50 = vld [vmem:[%s2295_s9 + $0x20] sm:$0xff] }
 0x54b   :  { %716 = vrot.lane.b32.xlu0 %v690_v61, %s1613_s8  ;;  %702 = vrot.lane.b32.xlu1 %v690_v61, %s1614_s1 }
 0x575   :  { %v693_v63 = vpop.permute.xlu2 %692 }
 0x57d   :  { %v709_v3 = vpop.permute.xlu2 %708 }
 0x585   :  { %v711_v7 = vpop.permute.xlu2 %710 }
 0x58d   :  { %v707_v0 = vpop.permute.xlu1 %706 }
 0x58e   :  { %v720_v1 = vsel %vm535_vm5, %v693_v63, %v707_v0  ;;  %v1478_v63 = vld [vmem:[%s2295_s9 + $0x10] sm:$0xff]  ;;  %v1477_v0 = vld [vmem:[%s2295_s9 + $0x8] sm:$0xff] }
 0x58f   :  { %v727_v2 = vmin.f32 %v685_v25, %v720_v1  ;;  %v1476_v1 = vld [vmem:[%s2295_s9] sm:$0xff] }
 0x591   :  { %748 = vrot.lane.b32.xlu0 %v727_v2, %s1615_s20  ;;  %734 = vrot.lane.b32.xlu1 %v727_v2, %s1610_s0 }
 0x595   :  { %v695_v4 = vpop.permute.xlu0 %694  ;;  %v677_v14 = vpop.permute.xlu2 %676 }
 0x596   :  { %v721_v5 = vsel %vm535_vm5, %v695_v4, %v709_v3 }
 0x597   :  { %v728_v6 = vmin.f32 %v686_v40, %v721_v5 }
 0x599   :  { %750 = vrot.lane.b32.xlu1 %v728_v6, %s1615_s20  ;;  %736 = vrot.lane.b32.xlu2 %v728_v6, %s1610_s0 }
 0x59d   :  { %v697_v13 = vpop.permute.xlu0 %696  ;;  %v715_v18 = vpop.permute.xlu2 %714 }
 0x59e   :  { %v722_v8 = vsel %vm535_vm5, %v697_v13, %v711_v7 }
 0x59f   :  { %v729_v9 = vmin.f32 %v687_v44, %v722_v8 }
 0x5a1   :  { %752 = vrot.lane.b32.xlu1 %v729_v9, %s1615_s20  ;;  %738 = vrot.lane.b32.xlu2 %v729_v9, %s1610_s0 }
 0x5a5   :  { %v713_v10 = vpop.permute.xlu0 %712  ;;  %v699_v11 = vpop.permute.xlu1 %698 }
 0x5a6   :  { %v723_v16 = vsel %vm535_vm5, %v699_v11, %v713_v10 }
 0x5a7   :  { %v730_v12 = vmin.f32 %v688_v48, %v723_v16 }
 0x5a9   :  { %740 = vrot.lane.b32.xlu0 %v730_v12, %s1610_s0  ;;  %754 = vrot.lane.b32.xlu2 %v730_v12, %s1615_s20 }
 0x5ad   :  { %v663_v15 = vpop.permute.xlu1 %662 }
 0x5ae   :  { %v684_v19 = vsel %vm492_vm4, %v663_v15, %v677_v14  ;;  %v1619_v14 = vmov 1.0|1.0  }
 0x5af   :  { %v691_v17 = vmin.f32 %v649_v54, %v684_v19 }
 0x5b1   :  { %718 = vrot.lane.b32.xlu1 %v691_v17, %s1613_s8  ;;  %704 = vrot.lane.b32.xlu0 %v691_v17, %s1614_s1 }
 0x5b5   :  { %v701_v20 = vpop.permute.xlu0 %700 }
 0x5b6   :  { %v724_v21 = vsel %vm535_vm5, %v701_v20, %v715_v18 }
 0x5b7   :  { %v731_v23 = vmin.f32 %v689_v58, %v724_v21  ;;  %v1483_v58 = vld [vmem:[%s2295_s9 + $0x38] sm:$0xff] }
 0x5b8   :  { %911 = vmatpush.bf16.msra.mxu1 %v1483_v58 }
 0x5b9   :  { %756 = vrot.lane.b32.xlu1 %v731_v23, %s1615_s20  ;;  %742 = vrot.lane.b32.xlu2 %v731_v23, %s1610_s0 }
 0x5bc   :  { %912 = vmatpush.bf16.msra.mxu1 %v1482_v59 }
 0x5bd   :  { %v717_v24 = vpop.permute.xlu0 %716  ;;  %v703_v22 = vpop.permute.xlu1 %702 }
 0x5be   :  { %v725_v26 = vsel %vm535_vm5, %v703_v22, %v717_v24 }
 0x5bf   :  { %v732_v27 = vmin.f32 %v690_v61, %v725_v26  ;;  %v1479_v61 = vld [vmem:[%s2295_s9 + $0x18] sm:$0xff]  ;;  %s1300_s9 = sshll.u32 %s2302_s16, 4  ;;  %s1301_s9 = int_to_ptr.hbm [resolvable:$true] %s1300_s9 }
 0x5c0   :  { %913 = vmatpush.bf16.msra.mxu1 %v1481_v60 }
 0x5c1   :  { %744 = vrot.lane.b32.xlu0 %v732_v27, %s1610_s0  ;;  %758 = vrot.lane.b32.xlu2 %v732_v27, %s1615_s20 }
 0x5c4   :  { %914 = vmatpush.bf16.msra.mxu1 %v1480_v50 }
 0x5c8   :  { %915 = vmatpush.bf16.msra.mxu1 %v1479_v61 }
 0x5cc   :  { %916 = vmatpush.bf16.msra.mxu1 %v1478_v63 }
 0x5d0   :  { %917 = vmatpush.bf16.msra.mxu1 %v1477_v0 }
 0x5d4   :  { %918 = vmatpush.bf16.msra.mxu1 %v1476_v1 }
 0x5f3   :  { %v737_v35 = vpop.permute.xlu2 %736 }
 0x5fb   :  { %v739_v28 = vpop.permute.xlu2 %738 }
 0x603   :  { %v749_v30 = vpop.permute.xlu0 %748  ;;  %v735_v32 = vpop.permute.xlu1 %734 }
 0x604   :  { %v762_v33 = vsel %vm578_vm6, %v735_v32, %v749_v30  ;;  %v755_v41 = vpop.permute.xlu2 %754 }
 0x605   :  { %v769_v34 = vmin.f32 %v727_v2, %v762_v33 }
 0x607   :  { %776 = vrot.lane.b32.xlu0 %v769_v34, %s1617_s22  ;;  %790 = vrot.lane.b32.xlu2 %v769_v34, %s1616_s5 }
 0x60b   :  { %v751_v36 = vpop.permute.xlu1 %750 }
 0x60c   :  { %v763_v37 = vsel %vm578_vm6, %v737_v35, %v751_v36 }
 0x60d   :  { %v2067_v25 = vmin.f32 %v728_v6, %v763_v37  ;;  %v1618_v6 = vmov 0.0  }
 0x60f   :  { %792 = vrot.lane.b32.xlu0 %v2067_v25, %s1616_s5  ;;  %778 = vrot.lane.b32.xlu1 %v2067_v25, %s1617_s22 }
 0x613   :  { %v753_v38 = vpop.permute.xlu1 %752  ;;  %v743_v49 = vpop.permute.xlu2 %742 }
 0x614   :  { %v764_v39 = vsel %vm578_vm6, %v739_v28, %v753_v38 }
 0x615   :  { %v2075_v40 = vmin.f32 %v729_v9, %v764_v39 }
 0x617   :  { %794 = vrot.lane.b32.xlu0 %v2075_v40, %s1616_s5  ;;  %780 = vrot.lane.b32.xlu1 %v2075_v40, %s1617_s22 }
 0x61b   :  { %v741_v42 = vpop.permute.xlu0 %740  ;;  %v759_v54 = vpop.permute.xlu2 %758 }
 0x61c   :  { %v765_v43 = vsel %vm578_vm6, %v741_v42, %v755_v41 }
 0x61d   :  { %v2083_v44 = vmin.f32 %v730_v12, %v765_v43 }
 0x61f   :  { %796 = vrot.lane.b32.xlu1 %v2083_v44, %s1616_s5  ;;  %782 = vrot.lane.b32.xlu2 %v2083_v44, %s1617_s22 }
 0x623   :  { %v719_v45 = vpop.permute.xlu1 %718  ;;  %v705_v46 = vpop.permute.xlu0 %704 }
 0x624   :  { %v726_v47 = vsel %vm535_vm5, %v705_v46, %v719_v45  ;;  %v1485_v46 = vld [vmem:[%s2297_s11 + $0x8] sm:$0xff] }
 0x625   :  { %v2091_v48 = vmin.f32 %v691_v17, %v726_v47  ;;  %988 = vmatpush.bf16.msra.mxu2 %v1485_v46  ;;  %v1484_v47 = vld [vmem:[%s2297_s11] sm:$0xff] }
 0x627   :  { %760 = vrot.lane.b32.xlu0 %v2091_v48, %s1615_s20  ;;  %746 = vrot.lane.b32.xlu2 %v2091_v48, %s1610_s0  ;;  %s1622_s20 = smov [#allocation7]  }
 0x629   :  { %989 = vmatpush.bf16.msra.mxu2 %v1484_v47 }
 0x62b   :  { %v757_v51 = vpop.permute.xlu1 %756 }
 0x62c   :  { %v766_v52 = vsel %vm578_vm6, %v743_v49, %v757_v51  ;;  %v1531_v49 = vld [vmem:[%s2296_s10] ss:$0 sm:$0xff] }
 0x62d   :  { %v2099_v53 = vmin.f32 %v731_v23, %v766_v52 }
 0x62f   :  { %798 = vrot.lane.b32.xlu0 %v2099_v53, %s1616_s5  ;;  %784 = vrot.lane.b32.xlu1 %v2099_v53, %s1617_s22 }
 0x633   :  { %v745_v55 = vpop.permute.xlu0 %744 }
 0x634   :  { %v767_v56 = vsel %vm578_vm6, %v745_v55, %v759_v54 }
 0x635   :  { %v2107_v57 = vmin.f32 %v732_v27, %v767_v56 }
 0x637   :  { %800 = vrot.lane.b32.xlu1 %v2107_v57, %s1616_s5  ;;  %786 = vrot.lane.b32.xlu2 %v2107_v57, %s1617_s22 }
 0x661   :  { %v791_v2 = vpop.permute.xlu2 %790 }
 0x679   :  { %v777_v3 = vpop.permute.xlu0 %776  ;;  %v783_v21 = vpop.permute.xlu2 %782 }
 0x67a   :  { %v804_v4 = vsel %vm621_vm7, %v777_v3, %v791_v2 }
 0x67b   :  { %v811_v5 = vmin.f32 %v769_v34, %v804_v4 }
 0x67d   :  { %vm818_vm15 = vcmp.eq.f32.partialorder %v1961_v62, %v811_v5 }
 0x67e   :  { %v1382_v7 = vsel %vm818_vm15, 1.0, %v1618_v6 }
 0x67f   :  { %v1494_v13 = vcvt.f32.s32 %v1382_v7 }
 0x681   :  { %1182 = vst [vmem:[#allocation6] sm:$0xff] %v1494_v13  ;;  %v793_v8 = vpop.permute.xlu0 %792  ;;  %v779_v9 = vpop.permute.xlu1 %778 }
 0x682   :  { %v805_v10 = vsel %vm621_vm7, %v779_v9, %v793_v8  ;;  %v747_v32 = vpop.permute.xlu2 %746 }
 0x683   :  { %v812_v11 = vmin.f32 %v2067_v25, %v805_v10  ;;  %v1487_v10 = vld [vmem:[%s2297_s11 + $0x18] sm:$0xff] }
 0x684   :  { %1068 = vmatpush.bf16.msra.mxu3 %v1487_v10 }
 0x685   :  { %vm819_vm0 = vcmp.eq.f32.partialorder %v1961_v62, %v812_v11  ;;  %v1486_v11 = vld [vmem:[%s2297_s11 + $0x10] sm:$0xff] }
 0x686   :  { %v1383_v16 = vsel %vm819_vm0, 1.0, %v1618_v6  ;;  %vm1421_vm3 = vmpackc.low %vm819_vm0, %vm818_vm15 }
 0x687   :  { %v1496_v12 = vcvt.f32.s32 %v1383_v16  ;;  %1422 = vmatmul.msk.bf16.vlgmr.msra.gmra.mxu1 %vm1421_vm3, %v1619_v14 }
 0x688   :  { %1069 = vmatpush.bf16.msra.mxu3 %v1486_v11 }
 0x689   :  { %1183 = vst [vmem:[#allocation6 + $0x8] sm:$0xff] %v1496_v12  ;;  %v795_v15 = vpop.permute.xlu0 %794  ;;  %v781_v19 = vpop.permute.xlu1 %780 }
 0x68a   :  { %v806_v17 = vsel %vm621_vm7, %v781_v19, %v795_v15 }
 0x68b   :  { %v813_v18 = vmin.f32 %v2075_v40, %v806_v17  ;;  %v1532_v17 = vld [vmem:[%s2298_s12] ss:$0 sm:$0xff] }
 0x68d   :  { %vm820_vm4 = vcmp.eq.f32.partialorder %v1961_v62, %v813_v18 }
 0x68e   :  { %v1384_v20 = vsel %vm820_vm4, 1.0, %v1618_v6 }
 0x68f   :  { %v1498_v23 = vcvt.f32.s32 %v1384_v20 }
 0x691   :  { %v797_v24 = vpop.permute.xlu1 %796  ;;  %1184 = vst [vmem:[#allocation6 + $0x10] sm:$0xff] %v1498_v23  ;;  %v787_v40 = vpop.permute.xlu2 %786 }
 0x692   :  { %v807_v22 = vsel %vm621_vm7, %v783_v21, %v797_v24 }
 0x693   :  { %v814_v26 = vmin.f32 %v2083_v44, %v807_v22 }
 0x695   :  { %vm821_vm5 = vcmp.eq.f32.partialorder %v1961_v62, %v814_v26 }
 0x696   :  { %v1385_v27 = vsel %vm821_vm5, 1.0, %v1618_v6  ;;  %vm1423_vm8 = vmpackc.low %vm821_vm5, %vm820_vm4 }
 0x697   :  { %1424 = vmatmul.msk.bf16.gmra.mxu1 %vm1423_vm8, %v1619_v14  ;;  %v1500_v30 = vcvt.f32.s32 %v1385_v27 }
 0x699   :  { %1185 = vst [vmem:[#allocation6 + $0x18] sm:$0xff] %v1500_v30  ;;  %v761_v33 = vpop.permute.xlu0 %760 }
 0x69a   :  { %v768_v34 = vsel %vm578_vm6, %v747_v32, %v761_v33 }
 0x69b   :  { %v775_v35 = vmin.f32 %v2091_v48, %v768_v34 }
 0x69d   :  { %802 = vrot.lane.b32.xlu0 %v775_v35, %s1616_s5  ;;  %788 = vrot.lane.b32.xlu2 %v775_v35, %s1617_s22 }
 0x6a1   :  { %v799_v36 = vpop.permute.xlu0 %798  ;;  %v785_v37 = vpop.permute.xlu1 %784 }
 0x6a2   :  { %v808_v25 = vsel %vm621_vm7, %v785_v37, %v799_v36 }
 0x6a3   :  { %v815_v28 = vmin.f32 %v2099_v53, %v808_v25 }
 0x6a5   :  { %vm822_vm9 = vcmp.eq.f32.partialorder %v1961_v62, %v815_v28 }
 0x6a6   :  { %v1386_v38 = vsel %vm822_vm9, 1.0, %v1618_v6 }
 0x6a7   :  { %v1502_v39 = vcvt.f32.s32 %v1386_v38 }
 0x6a9   :  { %v801_v41 = vpop.permute.xlu1 %800  ;;  %1186 = vst [vmem:[#allocation6 + $0x20] sm:$0xff] %v1502_v39 }
 0x6aa   :  { %v809_v42 = vsel %vm621_vm7, %v787_v40, %v801_v41 }
 0x6ab   :  { %v816_v43 = vmin.f32 %v2107_v57, %v809_v42 }
 0x6ad   :  { %vm823_vm6 = vcmp.eq.f32.partialorder %v1961_v62, %v816_v43 }
 0x6ae   :  { %v1387_v44 = vsel %vm823_vm6, 1.0, %v1618_v6  ;;  %vm1425_vm10 = vmpackc.low %vm823_vm6, %vm822_vm9 }
 0x6af   :  { %1426 = vmatmul.msk.bf16.gmra.mxu1 %vm1425_vm10, %v1619_v14  ;;  %v1504_v45 = vcvt.f32.s32 %v1387_v44 }
 0x6b1   :  { %1187 = vst [vmem:[#allocation6 + $0x28] sm:$0xff] %v1504_v45 }
 0x6f7   :  { %v789_v54 = vpop.permute.xlu2 %788 }
 0x704   :  { %v920_v48 = vpop.f32.mrf.mxu1 }
 0x705   :  { %v921_v51 = vadd.f32 %v1531_v49, %v920_v48  ;;  %v1489_v48 = vld [vmem:[%s2299_s13 + $0x8] sm:$0xff] }
 0x706   :  { %1146 = vmatpush.bf16.msra.mxu0 %v1489_v48 }
 0x707   :  { %v939_v55 = vmax.f32 %v921_v51, 0.0 }
 0x70c   :  { %v922_v52 = vpop.f32.mrf.mxu1 }
 0x70d   :  { %v923_v53 = vadd.f32 %v1531_v49, %v922_v52 }
 0x70f   :  { %v940_v56 = vmax.f32 %v923_v53, 0.0  ;;  %v803_v57 = vpop.permute.xlu0 %802 }
 0x710   :  { %v810_v58 = vsel %vm621_vm7, %v789_v54, %v803_v57 }
 0x711   :  { %v951_v59 = vpack.c.bf16 %v940_v56, %v939_v55  ;;  %v817_v60 = vmin.f32 %v775_v35, %v810_v58  ;;  %v1533_v58 = vld [vmem:[%s2298_s12 + $0x1] ss:$0 sm:$0xff] }
 0x713   :  { %1437 = vmatmul.msk.bf16.vlgmr.msra.gmra.mxu2 %vm164_vm2, %v951_v59  ;;  %vm824_vm11 = vcmp.eq.f32.partialorder %v1961_v62, %v817_v60 }
 0x714   :  { %v925_v50 = vpop.f32.mrf.mxu1  ;;  %v1388_v61 = vsel %vm824_vm11, 1.0, %v1618_v6  ;;  %vm1427_vm12 = vmpackc.low %vm824_vm11, %vm824_vm11 }
 0x715   :  { %1428 = vmatmul.msk.bf16.gmra.mxu1 %vm1427_vm12, %v1619_v14  ;;  %v1506_v63 = vcvt.f32.s32 %v1388_v61  ;;  %v926_v0 = vadd.f32 %v1531_v49, %v925_v50 }
 0x717   :  { %1188 = vst [vmem:[#allocation6 + $0x30] sm:$0xff] %v1506_v63  ;;  %v941_v3 = vmax.f32 %v926_v0, 0.0 }
 0x71c   :  { %v927_v1 = vpop.f32.mrf.mxu1 }
 0x71d   :  { %v928_v2 = vadd.f32 %v1531_v49, %v927_v1 }
 0x71f   :  { %v942_v31 = vmax.f32 %v928_v2, 0.0 }
 0x721   :  { %v952_v4 = vpack.c.bf16 %v942_v31, %v941_v3 }
 0x723   :  { %1438 = vmatmul.msk.bf16.gmra.mxu2 %vm164_vm2, %v952_v4 }
 0x72c   :  { %v930_v5 = vpop.f32.mrf.mxu1 }
 0x72d   :  { %v931_v7 = vadd.f32 %v1531_v49, %v930_v5 }
 0x72f   :  { %v943_v8 = vmax.f32 %v931_v7, 0.0 }
 0x734   :  { %v932_v13 = vpop.f32.mrf.mxu1 }
 0x735   :  { %v933_v62 = vadd.f32 %v1531_v49, %v932_v13 }
 0x737   :  { %v944_v9 = vmax.f32 %v933_v62, 0.0 }
 0x739   :  { %v953_v6 = vpack.c.bf16 %v944_v9, %v943_v8 }
 0x73b   :  { %1439 = vmatmul.msk.bf16.gmra.mxu2 %vm164_vm2, %v953_v6 }
 0x792   :  { %v935_v16 = vpop.f32.mrf.mxu1 }
 0x793   :  { %v936_v12 = vadd.f32 %v1531_v49, %v935_v16  ;;  %v1488_v49 = vld [vmem:[%s2299_s13] sm:$0xff] }
 0x794   :  { %1147 = vmatpush.bf16.msra.mxu0 %v1488_v49 }
 0x795   :  { %v945_v14 = vmax.f32 %v936_v12, 0.0 }
 0x796   :  { %v991_v15 = vpop.f32.mrf.mxu2 }
 0x797   :  { %v954_v19 = vpack.c.bf16 %v945_v14, %v945_v14  ;;  %v992_v20 = vadd.f32 %v1532_v17, %v991_v15 }
 0x799   :  { %1440 = vmatmul.msk.bf16.gmra.mxu2 %vm164_vm2, %v954_v19  ;;  %v1010_v23 = vmax.f32 %v992_v20, 0.0 }
 0x79a   :  { %v937_v18 = vpop.f32.mrf.mxu1 }
 0x79b   :  { %v1017_v26 = vadd.f32 %v1010_v23, %v939_v55 }
 0x79e   :  { %v993_v21 = vpop.f32.mrf.mxu2 }
 0x79f   :  { %v994_v24 = vadd.f32 %v1532_v17, %v993_v21 }
 0x7a1   :  { %v1011_v22 = vmax.f32 %v994_v24, 0.0 }
 0x7a3   :  { %v1018_v27 = vadd.f32 %v1011_v22, %v940_v56 }
 0x7a5   :  { %v1031_v30 = vpack.c.bf16 %v1018_v27, %v1017_v26 }
 0x7a6   :  { %v996_v32 = vpop.f32.mrf.mxu2 }
 0x7a7   :  { %1454 = vmatmul.msk.bf16.vlgmr.msra.gmra.mxu3 %vm164_vm2, %v1031_v30  ;;  %v997_v33 = vadd.f32 %v1532_v17, %v996_v32  ;;  %v1535_v32 = vld [vmem:[%s2308_s21] sm:$0xff] }
 0x7a9   :  { %v1012_v35 = vmax.f32 %v997_v33, 0.0 }
 0x7ab   :  { %v1019_v25 = vadd.f32 %v1012_v35, %v941_v3 }
 0x7ae   :  { %v998_v34 = vpop.f32.mrf.mxu2 }
 0x7af   :  { %v999_v36 = vadd.f32 %v1532_v17, %v998_v34 }
 0x7b1   :  { %v1013_v37 = vmax.f32 %v999_v36, 0.0 }
 0x7b3   :  { %v1020_v28 = vadd.f32 %v1013_v37, %v942_v31  ;;  %v1536_v37 = vld [vmem:[%s2308_s21 + $0x8] sm:$0xff] }
 0x7b5   :  { %v1032_v38 = vpack.c.bf16 %v1020_v28, %v1019_v25 }
 0x7b7   :  { %1455 = vmatmul.msk.bf16.gmra.mxu3 %vm164_vm2, %v1032_v38 }
 0x7be   :  { %v1001_v39 = vpop.f32.mrf.mxu2 }
 0x7bf   :  { %v1002_v40 = vadd.f32 %v1532_v17, %v1001_v39 }
 0x7c1   :  { %v1014_v42 = vmax.f32 %v1002_v40, 0.0 }
 0x7c3   :  { %v1021_v45 = vadd.f32 %v1014_v42, %v943_v8 }
 0x7c6   :  { %v1003_v41 = vpop.f32.mrf.mxu2 }
 0x7c7   :  { %v1004_v43 = vadd.f32 %v1532_v17, %v1003_v41 }
 0x7c9   :  { %v1015_v44 = vmax.f32 %v1004_v43, 0.0  ;;  %v1537_v43 = vld [vmem:[%s2308_s21 + $0x10] sm:$0xff] }
 0x7cb   :  { %v1022_v46 = vadd.f32 %v1015_v44, %v944_v9 }
 0x7cd   :  { %v1033_v47 = vpack.c.bf16 %v1022_v46, %v1021_v45 }
 0x7cf   :  { %1456 = vmatmul.msk.bf16.gmra.mxu3 %vm164_vm2, %v1033_v47 }
 0x81c   :  { %v1006_v51 = vpop.f32.mrf.mxu2 }
 0x81d   :  { %v1007_v52 = vadd.f32 %v1532_v17, %v1006_v51  ;;  %v1538_v51 = vld [vmem:[%s2308_s21 + $0x18] sm:$0xff] }
 0x81f   :  { %v1016_v53 = vmax.f32 %v1007_v52, 0.0 }
 0x821   :  { %v1023_v54 = vadd.f32 %v1016_v53, %v945_v14 }
 0x823   :  { %v1034_v55 = vpack.c.bf16 %v1023_v54, %v1023_v54 }
 0x824   :  { %v1008_v56 = vpop.f32.mrf.mxu2 }
 0x825   :  { %1457 = vmatmul.msk.bf16.gmra.mxu3 %vm164_vm2, %v1034_v55 }
 0x82a   :  { %v1071_v57 = vpop.f32.mrf.mxu3 }
 0x82b   :  { %v1072_v59 = vadd.f32 %v1533_v58, %v1071_v57 }
 0x82d   :  { %v1090_v50 = vmax.f32 %v1072_v59, 0.0 }
 0x82f   :  { %v1097_v0 = vadd.f32 %v1090_v50, %v1017_v26  ;;  %v1534_v26 = vld [vmem:[%s2300_s14] ss:$0 sm:$0xff] }
 0x832   :  { %v1073_v60 = vpop.f32.mrf.mxu3 }
 0x833   :  { %v1074_v61 = vadd.f32 %v1533_v58, %v1073_v60 }
 0x835   :  { %v1091_v63 = vmax.f32 %v1074_v61, 0.0 }
 0x837   :  { %v1098_v1 = vadd.f32 %v1091_v63, %v1018_v27 }
 0x839   :  { %v1109_v2 = vpack.c.bf16 %v1098_v1, %v1097_v0  ;;  %v1540_v1 = vld [vmem:[%s2308_s21 + $0x28] sm:$0xff] }
 0x83a   :  { %v1076_v3 = vpop.f32.mrf.mxu3 }
 0x83b   :  { %1466 = vmatmul.msk.bf16.vlgmr.msra.gmra.mxu0 %vm164_vm2, %v1109_v2  ;;  %v1077_v31 = vadd.f32 %v1533_v58, %v1076_v3 }
 0x83d   :  { %v1092_v5 = vmax.f32 %v1077_v31, 0.0 }
 0x83f   :  { %v1099_v62 = vadd.f32 %v1092_v5, %v1019_v25  ;;  %v1232_v5 = vshrl.u32 %v449_v29, 7 }
 0x842   :  { %v1078_v4 = vpop.f32.mrf.mxu3 }
 0x843   :  { %v1079_v7 = vadd.f32 %v1533_v58, %v1078_v4 }
 0x845   :  { %v1093_v13 = vmax.f32 %v1079_v7, 0.0  ;;  %v1238_v7 = vadd.s32 48, %v1232_v5 }
 0x847   :  { %v1100_v8 = vadd.f32 %v1093_v13, %v1020_v28 }
 0x849   :  { %v1110_v9 = vpack.c.bf16 %v1100_v8, %v1099_v62  ;;  %v1541_v8 = vld [vmem:[%s2308_s21 + $0x30] sm:$0xff] }
 0x84b   :  { %1467 = vmatmul.msk.bf16.gmra.mxu0 %vm164_vm2, %v1110_v9 }
 0x852   :  { %v1081_v6 = vpop.f32.mrf.mxu3 }
 0x853   :  { %v1082_v10 = vadd.f32 %v1533_v58, %v1081_v6 }
 0x855   :  { %v1094_v16 = vmax.f32 %v1082_v10, 0.0 }
 0x857   :  { %v1101_v15 = vadd.f32 %v1094_v16, %v1021_v45 }
 0x85a   :  { %v1083_v11 = vpop.f32.mrf.mxu3 }
 0x85b   :  { %v1084_v12 = vadd.f32 %v1533_v58, %v1083_v11 }
 0x85d   :  { %v1095_v14 = vmax.f32 %v1084_v12, 0.0 }
 0x85f   :  { %v1102_v19 = vadd.f32 %v1095_v14, %v1022_v46 }
 0x861   :  { %v1111_v17 = vpack.c.bf16 %v1102_v19, %v1101_v15 }
 0x863   :  { %1468 = vmatmul.msk.bf16.gmra.mxu0 %vm164_vm2, %v1111_v17 }
 0x8a8   :  { %v1086_v18 = vpop.f32.mrf.mxu3 }
 0x8a9   :  { %v1087_v20 = vadd.f32 %v1533_v58, %v1086_v18  ;;  %v1539_v58 = vld [vmem:[%s2308_s21 + $0x20] sm:$0xff]  ;;  %s1621_s21 = smov 128  }
 0x8aa   :  { %1306 = dma.vmem_to_hbm [thread:$0]  %s1299_s18, 896, %s1301_s9, [#allocation4], %s1621_s21, %s1621_s21, %s1617_s22  }
 0x8ab   :  { %v1096_v21 = vmax.f32 %v1087_v20, 0.0  ;;  %s1312_s22 = sshll.u32 %s2303_s17, 4  ;;  %s1313_s22 = int_to_ptr.hbm [resolvable:$true] %s1312_s22 }
 0x8ad   :  { %v1103_v23 = vadd.f32 %v1096_v21, %v1023_v54 }
 0x8af   :  { %v1112_v24 = vpack.c.bf16 %v1103_v23, %v1103_v23 }
 0x8b0   :  { %v1088_v22 = vpop.f32.mrf.mxu3 }
 0x8b1   :  { %1469 = vmatmul.msk.bf16.gmra.mxu0 %vm164_vm2, %v1112_v24  ;;  %vm1254_vm2 = vcmp.lt.s32.totalorder %v1238_v7, 50 }
 0x8b8   :  { %v1149_v27 = vpop.f32.mrf.mxu0 }
 0x8b9   :  { %v1150_v30 = vadd.f32 %v1534_v26, %v1149_v27 }
 0x8bb   :  { %1168 = vst.msk [vmem:[%s2301_s15] sm:$0xff] %vm88_vm1, %v1150_v30  ;;  %v1189_v33 = vsub.f32 %v1150_v30, %v1535_v32 }
 0x8bd   :  { %v1196_v36 = vmul.f32 %v1189_v33, %v1189_v33 }
 0x8bf   :  { %v1203_v38 = vsel %vm88_vm1, %v1196_v36, 0.0 }
 0x8c0   :  { %v1151_v34 = vpop.f32.mrf.mxu0 }
 0x8c1   :  { %v1152_v35 = vadd.f32 %v1534_v26, %v1151_v34 }
 0x8c3   :  { %1169 = vst.msk [vmem:[%s2301_s15 + $0x8] sm:$0xff] %vm88_vm1, %v1152_v35  ;;  %v1190_v25 = vsub.f32 %v1152_v35, %v1536_v37 }
 0x8c5   :  { %v1197_v28 = vmul.f32 %v1190_v25, %v1190_v25 }
 0x8c7   :  { %v1204_v39 = vsel %vm88_vm1, %v1197_v28, 0.0 }
 0x8c8   :  { %v1205_v40 = vadd.f32 %v1204_v39, %v1203_v38  ;;  %v1154_v41 = vpop.f32.mrf.mxu0 }
 0x8c9   :  { %v1155_v42 = vadd.f32 %v1534_v26, %v1154_v41 }
 0x8cb   :  { %1170 = vst.msk [vmem:[%s2301_s15 + $0x10] sm:$0xff] %vm88_vm1, %v1155_v42  ;;  %v1191_v44 = vsub.f32 %v1155_v42, %v1537_v43 }
 0x8cd   :  { %v1198_v45 = vmul.f32 %v1191_v44, %v1191_v44 }
 0x8cf   :  { %v1206_v46 = vsel %vm88_vm1, %v1198_v45, 0.0 }
 0x8d0   :  { %v1207_v47 = vadd.f32 %v1206_v46, %v1205_v40  ;;  %v1156_v48 = vpop.f32.mrf.mxu0 }
 0x8d1   :  { %v1157_v49 = vadd.f32 %v1534_v26, %v1156_v48 }
 0x8d3   :  { %1171 = vst.msk [vmem:[%s2301_s15 + $0x18] sm:$0xff] %vm88_vm1, %v1157_v49  ;;  %v1192_v52 = vsub.f32 %v1157_v49, %v1538_v51 }
 0x8d5   :  { %v1199_v53 = vmul.f32 %v1192_v52, %v1192_v52 }
 0x8d7   :  { %v1208_v54 = vsel %vm88_vm1, %v1199_v53, 0.0 }
 0x8d8   :  { %v1209_v55 = vadd.f32 %v1208_v54, %v1207_v47 }
 0x8e0   :  { %v1159_v56 = vpop.f32.mrf.mxu0 }
 0x8e1   :  { %v1160_v57 = vadd.f32 %v1534_v26, %v1159_v56 }
 0x8e3   :  { %1172 = vst.msk [vmem:[%s2301_s15 + $0x20] sm:$0xff] %vm88_vm1, %v1160_v57  ;;  %v1193_v59 = vsub.f32 %v1160_v57, %v1539_v58 }
 0x8e5   :  { %v1200_v60 = vmul.f32 %v1193_v59, %v1193_v59 }
 0x8e7   :  { %v1210_v50 = vsel %vm88_vm1, %v1200_v60, 0.0 }
 0x8e8   :  { %v1161_v61 = vpop.f32.mrf.mxu0  ;;  %v1211_v63 = vadd.f32 %v1210_v50, %v1209_v55 }
 0x8e9   :  { %v1162_v0 = vadd.f32 %v1534_v26, %v1161_v61 }
 0x8eb   :  { %1173 = vst.msk [vmem:[%s2301_s15 + $0x28] sm:$0xff] %vm88_vm1, %v1162_v0  ;;  %v1194_v2 = vsub.f32 %v1162_v0, %v1540_v1 }
 0x8ed   :  { %v1201_v3 = vmul.f32 %v1194_v2, %v1194_v2 }
 0x8ef   :  { %v1212_v31 = vsel %vm88_vm1, %v1201_v3, 0.0 }
 0x8f0   :  { %v1213_v4 = vadd.f32 %v1212_v31, %v1211_v63 }
 0x92e   :  { %v1164_v13 = vpop.f32.mrf.mxu0 }
 0x92f   :  { %v1165_v62 = vadd.f32 %v1534_v26, %v1164_v13 }
 0x931   :  { %1174 = vst.msk [vmem:[%s2301_s15 + $0x30] sm:$0xff] %vm88_vm1, %v1165_v62  ;;  %v1195_v9 = vsub.f32 %v1165_v62, %v1541_v8 }
 0x933   :  { %v1261_v6 = vsel %vm1254_vm2, %v1195_v9, 0.0  ;;  %v1202_v10 = vmul.f32 %v1195_v9, %v1195_v9 }
 0x934   :  { %v1268_v11 = vmul.f32 %v1261_v6, %v1261_v6 }
 0x935   :  { %v1214_v16 = vsel %vm88_vm1, %v1202_v10, 0.0 }
 0x936   :  { %v1166_v29 = vpop.f32.mrf.mxu0  ;;  %v1215_v12 = vadd.f32 %v1214_v16, %v1213_v4  ;;  %v1280_v14 = vsel %vm88_vm1, %v1268_v11, 0.0 }
 0x937   :  { %v1281_v15 = vadd.f32 %v1280_v14, %v1213_v4 }
 0x938   :  { %1216 = vadd.xlane.f32.xlu1 %v1215_v12 }
 0x939   :  { %1282 = vadd.xlane.f32.xlu2 %v1281_v15 }
 0x9ab   :  { %v1217_v19 = vpop.xlane.xlu1 %1216 }
 0x9ac   :  { %v1218_v17 = vrot.slane %v1217_v19, 4  ;;  %v1283_v18 = vpop.xlane.xlu2 %1282 }
 0x9ad   :  { %v1284_v20 = vrot.slane %v1283_v18, 4 }
 0x9ae   :  { %v1219_v21 = vadd.f32 %v1218_v17, %v1217_v19 }
 0x9af   :  { %v1285_v23 = vadd.f32 %v1284_v20, %v1283_v18 }
 0x9b0   :  { %v1220_v24 = vrot.slane %v1219_v21, 2 }
 0x9b1   :  { %v1286_v22 = vrot.slane %v1285_v23, 2 }
 0x9b2   :  { %v1221_v26 = vadd.f32 %v1220_v24, %v1219_v21 }
 0x9b3   :  { %v1287_v27 = vadd.f32 %v1286_v22, %v1285_v23 }
 0x9b4   :  { %v1222_v30 = vrot.slane %v1221_v26, 1 }
 0x9b5   :  { %v1288_v32 = vrot.slane %v1287_v27, 1 }
 0x9b6   :  { %v1223_v33 = vadd.f32 %v1222_v30, %v1221_v26 }
 0x9b7   :  { %v1289_v34 = vadd.f32 %v1288_v32, %v1287_v27 }
 0x9b8   :  { %1507 = vpush %v1223_v33 }
 0x9b9   :  { %1509 = vpush %v1289_v34 }
 0x9e9   :  { %s1508_s8 = spop %1507 }
 0x9ea   :  { %s1510_s1 = spop %1509 }
 0x9eb   :  { %1291 = sst [smem:[#allocation7]] %s1510_s1 }
 0x9ec   :  { %1315 = dma.smem_to_hbm %s1622_s20, 16, %s1313_s22, [#allocation5]  }
 0x9ed   :  { %1604 = dma.done.wait [#allocation4], 896  }
 0x9ee   :  { %1605 = vsyncadd [#allocation4], 4294966400 }
 0x9ef   :  { %1606 = dma.done.wait [#allocation5], 16  }
 0x9f0   :  { %1607 = vsyncadd [#allocation5], 4294967280 }
 0x9f1   :  { %1326 = sfence }
 0x9f2   :  { %1327 = vsyncpa [#allocation3], 1 }
 0x9f3   :  { %1328 = vsyncpa [#allocation4], 1 }
 0x9f4   :  { %1329 = vsyncpa [#allocation5], 1 }

</bundles_post_ra>
